<compile_context>
chip_gen: v7x
topology: tpu7x:2x2x1
jax: 0.10.0
libtpu: 0.0.40
codegen_flags: <defaults>
</compile_context>

<pallas_src>
import numpy as np
import jax
import jax.numpy as jnp
from jax.experimental import pallas as pl
from jax.experimental.pallas import tpu as pltpu

EPS = 1e-5


# ----------------------------------------------------------------------------
# The single fused Pallas kernel (one invocation, everything resident in VMEM)
# ----------------------------------------------------------------------------
def fused_net_kernel(x5_ref, w1_ref, w2_ref, fw1_ref, fw2_ref, fw3_ref,
                     vecs_ref, o_ref):
    N = x5_ref.shape[0] // 12          # batch size (static)
    G = N // 16                        # rows after view(-1, 256)

    # ---- packed small constants (one operand, static slices) ----
    b1p   = vecs_ref[0:1, :]           # conv1 bias, tiled & lane-padded (1,256)
    g1d   = vecs_ref[1:2, :]           # BatchNorm1d gamma               (1,256)
    be1d  = vecs_ref[2:3, :]           # BatchNorm1d beta                (1,256)
    fb1   = vecs_ref[3:4, :]           # fc1 bias                        (1,256)
    g2d8  = vecs_ref[4:5, 0:8]         # BatchNorm2d gamma               (1,8)
    be2d8 = vecs_ref[5:6, 0:8]         # BatchNorm2d beta                (1,8)
    b2t   = vecs_ref[6:7, 0:32]        # conv2 bias, tiled x2            (1,32)
    fb2   = vecs_ref[7:8, 0:64]        # fc2 bias                        (1,64)
    fb3   = vecs_ref[8:9, 0:10]        # fc3 bias                        (1,10)

    # ---- conv1 (5x5, 1->8) + bias + relu : ONE matmul over all 25 taps ----
    # x5 (built in the wrapper) has rows (parity, rp, n') and lanes ki*16 + w.
    # The banded weight puts even output columns at lanes s'*8+co and odd
    # output columns at lanes 128 + s'*8+co.
    y = jnp.dot(x5_ref[...], w1_ref[...], preferred_element_type=jnp.float32)
    y = jnp.maximum(y + b1p, 0.0)                       # (12N, 256)

    # ---- 2x2 max-pool: both splits are vreg/row-block aligned ----
    pc = jnp.maximum(y[:, 0:128], y[:, 128:256])        # columns    (12N, 128)
    p1 = jnp.maximum(pc[0:6 * N, :], pc[6 * N:12 * N, :])  # rows     (6N, 128)
    # p1 rows = rp*N + n', lanes s'*8 + co valid for lanes < 48, zero elsewhere

    # ---- BatchNorm2d (batch statistics, biased variance, eps=1e-5) ----
    def fold6(v):      # (1, 128) -> (1, 8): sum of the 6 s'-lane groups
        return (v[:, 0:8] + v[:, 8:16] + v[:, 16:24]
                + v[:, 24:32] + v[:, 32:40] + v[:, 40:48])

    inv_cnt = 1.0 / (36.0 * N)                          # N * H * W per channel
    mu8 = fold6(jnp.sum(p1, axis=0, keepdims=True)) * inv_cnt
    ex2 = fold6(jnp.sum(p1 * p1, axis=0, keepdims=True)) * inv_cnt
    var8 = ex2 - mu8 * mu8
    a8 = jax.lax.rsqrt(var8 + EPS) * g2d8               # per-channel scale
    c8 = be2d8 - mu8 * a8                               # per-channel shift
    zpad = jnp.zeros((1, 80), jnp.float32)
    a128 = jnp.concatenate([a8] * 6 + [zpad], axis=1)   # (1, 128)
    c128 = jnp.concatenate([c8] * 6 + [zpad], axis=1)
    bn1 = p1 * a128 + c128                              # (6N, 128); pad lanes = 0

    # ---- conv2 (5x5, 8->16) + relu + 2x2 pool ----
    # 5 banded matmul-accumulates over CONTIGUOUS row slices of bn1 (no lane
    # gathers).  Output rows r*N+n' (r in {0,1}), lanes s*16+co (s in {0,1}).
    y2 = jnp.dot(bn1[0:2 * N, :], w2_ref[0:128, :],
                 preferred_element_type=jnp.float32)
    for ki in range(1, 5):
        y2 = y2 + jnp.dot(bn1[ki * N:(ki + 2) * N, :],
                          w2_ref[ki * 128:(ki + 1) * 128, :],
                          preferred_element_type=jnp.float32)
    y2 = jnp.maximum(y2 + b2t, 0.0)                     # (2N, 32)
    p2 = jnp.maximum(y2[0:N, :], y2[N:2 * N, :])        # pool rows
    p2 = jnp.maximum(p2[:, 0:16], p2[:, 16:32])         # pool cols  (N, 16)

    # ---- x.view(-1, 256): sample order n' = s*G + g makes this a plain
    #      lane-concatenation of 16 contiguous row blocks. ----
    flat = jnp.concatenate([p2[si * G:(si + 1) * G, :] for si in range(16)],
                           axis=1)                      # (G, 256)

    # ---- BatchNorm1d + fc1/relu + fc2/relu + fc3 + softmax (exact) ----
    inv_g = 1.0 / G
    mu = jnp.sum(flat, axis=0, keepdims=True) * inv_g
    d = flat - mu
    var = jnp.sum(d * d, axis=0, keepdims=True) * inv_g
    h = d * jax.lax.rsqrt(var + EPS) * g1d + be1d
    h = jnp.maximum(jnp.dot(h, fw1_ref[...],
                            preferred_element_type=jnp.float32) + fb1, 0.0)
    h = jnp.maximum(jnp.dot(h, fw2_ref[...],
                            preferred_element_type=jnp.float32) + fb2, 0.0)
    logits = jnp.dot(h, fw3_ref[...],
                     preferred_element_type=jnp.float32) + fb3
    z = logits - jnp.max(logits, axis=1, keepdims=True)
    e = jnp.exp(z)
    # exact normalization: rows sum to 1 within f32 rounding
    o_ref[...] = e / jnp.sum(e, axis=1, keepdims=True)


# ----------------------------------------------------------------------------
# One-time weight/layout preparation (outside jit)
# ----------------------------------------------------------------------------
def prepare_params(p):
    w1 = np.asarray(p['w1'], np.float32)            # (8, 1, 5, 5)
    b1 = np.asarray(p['b1'], np.float32)
    w2 = np.asarray(p['w2'], np.float32)            # (16, 8, 5, 5)
    b2 = np.asarray(p['b2'], np.float32)

    # Banded conv1 weight, lane-padded: rows ki*16 + w (w = input column);
    # even output column s=2s' -> cols s'*8+co, odd s=2s'+1 -> cols 128+s'*8+co.
    w1p = np.zeros((128, 256), np.float32)
    for ki in range(5):
        for kj in range(5):
            for s in range(12):
                col = (s // 2) * 8 + 128 * (s % 2)
                w1p[ki * 16 + s + kj, col:col + 8] = w1[:, 0, ki, kj]

    # Banded conv2 weights, one (128, 32) block per ki (rows >= 48 stay zero):
    # rows s'*8 + c, cols s*16 + co, value w2[co, c, ki, s'-s].
    w2k = np.zeros((5 * 128, 32), np.float32)
    for ki in range(5):
        for kj in range(5):
            for s in range(2):
                sp = s + kj
                w2k[ki * 128 + sp * 8: ki * 128 + sp * 8 + 8,
                    s * 16: s * 16 + 16] = w2[:, :, ki, kj].T

    # All small vectors packed into a single (8,128)-aligned constant.
    vecs = np.zeros((16, 256), np.float32)
    vecs[0, 0:48] = np.tile(b1, 6)
    vecs[0, 128:176] = np.tile(b1, 6)
    vecs[1, :] = np.asarray(p['g1d'], np.float32)
    vecs[2, :] = np.asarray(p['be1d'], np.float32)
    vecs[3, :] = np.asarray(p['fc1b'], np.float32)
    vecs[4, 0:8] = np.asarray(p['g2d'], np.float32)
    vecs[5, 0:8] = np.asarray(p['be2d'], np.float32)
    vecs[6, 0:32] = np.tile(b2, 2)
    vecs[7, 0:64] = np.asarray(p['fc2b'], np.float32)
    vecs[8, 0:10] = np.asarray(p['fc3b'], np.float32)

    return dict(
        w1p=jnp.asarray(w1p),
        w2k=jnp.asarray(w2k),
        fw1=jnp.asarray(np.asarray(p['fc1w'], np.float32).T),   # (256, 256)
        fw2=jnp.asarray(np.asarray(p['fc2w'], np.float32).T),   # (256, 64)
        fw3=jnp.asarray(np.asarray(p['fc3w'], np.float32).T),   # (64, 10)
        vecs=jnp.asarray(vecs),
    )


@jax.jit
def net_forward(x, prep):
    # x: (N, 1, 16, 16) float32 (NCHW), N a multiple of 16
    N = x.shape[0]
    G = N // 16
    # Sample reorder n' = (n mod 16)*G + (n // 16); rows (h, n'), width on lanes.
    x_h = jnp.transpose(x.reshape(G, 16, 16, 16), (2, 1, 0, 3)).reshape(16, N, 16)
    # conv1 im2col in the wrapper: 5 row-shifted copies stacked on lanes,
    # rows reordered to (parity, row-pair, n'), lanes zero-padded to 128.
    x5 = jnp.concatenate([x_h[ki:ki + 12] for ki in range(5)], axis=-1)  # (12,N,80)
    x5 = x5.reshape(6, 2, N, 80).transpose(1, 0, 2, 3).reshape(12 * N, 80)
    x5 = jnp.pad(x5, ((0, 0), (0, 48)))                                   # (12N,128)

    inputs = (x5, prep['w1p'], prep['w2k'],
              prep['fw1'], prep['fw2'], prep['fw3'], prep['vecs'])

    return pl.pallas_call(
        fused_net_kernel,
        out_shape=jax.ShapeDtypeStruct((G, 10), jnp.float32),
        in_specs=[pl.BlockSpec(memory_space=pltpu.MemorySpace.VMEM)
                  for _ in inputs],
        out_specs=pl.BlockSpec(memory_space=pltpu.MemorySpace.VMEM),
    )(*inputs)


# ----------------------------------------------------------------------------
# Pure-JAX reference for validation
# ----------------------------------------------------------------------------
def reference_forward(x, p):
    def conv(v, w, b):
        o = jax.lax.conv_general_dilated(
            v, w, (1, 1), 'VALID', dimension_numbers=('NCHW', 'OIHW', 'NCHW'))
        return o + b[None, :, None, None]

    def maxpool2(v):
        n, c, hh, ww = v.shape
        return v.reshape(n, c, hh // 2, 2, ww // 2, 2).max(axis=(3, 5))

    def bn(v, g, b, axes):
        mu = v.mean(axis=axes, keepdims=True)
        var = ((v - mu) ** 2).mean(axis=axes, keepdims=True)
        shp = [1] * v.ndim
        shp[1] = -1
        return (g.reshape(shp) * (v - mu) / jnp.sqrt(var + EPS)
                + b.reshape(shp))

    h = maxpool2(jnp.maximum(conv(x, p['w1'], p['b1']), 0.0))
    h = bn(h, p['g2d'], p['be2d'], (0, 2, 3))
    h = maxpool2(jnp.maximum(conv(h, p['w2'], p['b2']), 0.0))
    h = h.reshape(-1, 256)
    h = bn(h, p['g1d'], p['be1d'], (0,))
    h = jnp.maximum(h @ p['fc1w'].T + p['fc1b'], 0.0)
    h = jnp.maximum(h @ p['fc2w'].T + p['fc2b'], 0.0)
    return jax.nn.softmax(h @ p['fc3w'].T + p['fc3b'], axis=1)


def init_params(key):
    ks = jax.random.split(key, 10)
    s = 0.1
    return dict(
        w1=jax.random.normal(ks[0], (8, 1, 5, 5), jnp.float32) * s,
        b1=jax.random.normal(ks[1], (8,), jnp.float32) * s,
        w2=jax.random.normal(ks[2], (16, 8, 5, 5), jnp.float32) * s,
        b2=jax.random.normal(ks[3], (16,), jnp.float32) * s,
        fc1w=jax.random.normal(ks[4], (256, 256), jnp.float32) * s,
        fc1b=jax.random.normal(ks[5], (256,), jnp.float32) * s,
        fc2w=jax.random.normal(ks[6], (64, 256), jnp.float32) * s,
        fc2b=jax.random.normal(ks[7], (64,), jnp.float32) * s,
        fc3w=jax.random.normal(ks[8], (10, 64), jnp.float32) * s,
        fc3b=jax.random.normal(ks[9], (10,), jnp.float32) * s,
        # BatchNorm affine params at PyTorch init (gamma=1, beta=0)
        g2d=jnp.ones((8,), jnp.float32), be2d=jnp.zeros((8,), jnp.float32),
        g1d=jnp.ones((256,), jnp.float32), be1d=jnp.zeros((256,), jnp.float32),
    )


if __name__ == "__main__":
    key = jax.random.PRNGKey(0)
    kx, kp = jax.random.split(key)
    # batch must be a multiple of 16 because of view(-1, 256) with 16x16 input;
    # 32 gives 2 output rows so BatchNorm1d batch statistics are well defined.
    N = 32
    x = jax.random.uniform(kx, (N, 1, 16, 16), jnp.float32)
    params = init_params(kp)
    prep = prepare_params(params)          # one-time weight prep, outside jit

    out = net_forward(x, prep)
    out = jax.block_until_ready(out)

    ref = reference_forward(x, params)
    assert out.shape == (N // 16, 10), out.shape
    err = float(jnp.max(jnp.abs(out - ref)))
    assert err < 2e-3, err
    # exact softmax normalization: rows sum to 1 within f32 rounding
    assert jnp.allclose(out.sum(axis=1), 1.0, atol=1e-4)

    print("KERNEL_OK")
</pallas_src>

<mosaic_0001>
module attributes {stable_mosaic.version = 11 : i64} {
  func.func @fused_net_kernel(%arg0: memref<384x128xf32, #tpu.memory_space<vmem>>, %arg1: memref<128x256xf32, #tpu.memory_space<vmem>>, %arg2: memref<640x32xf32, #tpu.memory_space<vmem>>, %arg3: memref<256x256xf32, #tpu.memory_space<vmem>>, %arg4: memref<256x64xf32, #tpu.memory_space<vmem>>, %arg5: memref<64x10xf32, #tpu.memory_space<vmem>>, %arg6: memref<16x256xf32, #tpu.memory_space<vmem>>, %arg7: memref<2x10xf32, #tpu.memory_space<vmem>>) attributes {dimension_semantics = [], scalar_prefetch = 0 : i64, scratch_operands = 0 : i64, tpu.core_type = #tpu.core_type<tc>} {
    %c0 = arith.constant 0 : index
    %c0_0 = arith.constant 0 : index
    %0 = vector.load %arg6[%c0, %c0_0] : memref<16x256xf32, #tpu.memory_space<vmem>>, vector<1x256xf32>
    %c1 = arith.constant 1 : index
    %c0_1 = arith.constant 0 : index
    %1 = vector.load %arg6[%c1, %c0_1] : memref<16x256xf32, #tpu.memory_space<vmem>>, vector<1x256xf32>
    %c2 = arith.constant 2 : index
    %c0_2 = arith.constant 0 : index
    %2 = vector.load %arg6[%c2, %c0_2] : memref<16x256xf32, #tpu.memory_space<vmem>>, vector<1x256xf32>
    %c3 = arith.constant 3 : index
    %c0_3 = arith.constant 0 : index
    %3 = vector.load %arg6[%c3, %c0_3] : memref<16x256xf32, #tpu.memory_space<vmem>>, vector<1x256xf32>
    %c4 = arith.constant 4 : index
    %c0_4 = arith.constant 0 : index
    %4 = vector.load %arg6[%c4, %c0_4] : memref<16x256xf32, #tpu.memory_space<vmem>>, vector<1x8xf32>
    %c5 = arith.constant 5 : index
    %c0_5 = arith.constant 0 : index
    %5 = vector.load %arg6[%c5, %c0_5] : memref<16x256xf32, #tpu.memory_space<vmem>>, vector<1x8xf32>
    %c6 = arith.constant 6 : index
    %c0_6 = arith.constant 0 : index
    %6 = vector.load %arg6[%c6, %c0_6] : memref<16x256xf32, #tpu.memory_space<vmem>>, vector<1x32xf32>
    %c7 = arith.constant 7 : index
    %c0_7 = arith.constant 0 : index
    %7 = vector.load %arg6[%c7, %c0_7] : memref<16x256xf32, #tpu.memory_space<vmem>>, vector<1x64xf32>
    %c8 = arith.constant 8 : index
    %c0_8 = arith.constant 0 : index
    %8 = vector.load %arg6[%c8, %c0_8] : memref<16x256xf32, #tpu.memory_space<vmem>>, vector<1x10xf32>
    %c0_9 = arith.constant 0 : index
    %c0_10 = arith.constant 0 : index
    %9 = vector.load %arg0[%c0_9, %c0_10] : memref<384x128xf32, #tpu.memory_space<vmem>>, vector<384x128xf32>
    %c0_11 = arith.constant 0 : index
    %c0_12 = arith.constant 0 : index
    %10 = vector.load %arg1[%c0_11, %c0_12] : memref<128x256xf32, #tpu.memory_space<vmem>>, vector<128x256xf32>
    %cst = arith.constant dense<0.000000e+00> : vector<384x256xf32>
    %11 = tpu.matmul %9, %10, %cst {dimension_numbers = #tpu.dot_dimension_numbers<[1], [0], [0], [1], [0, 0, 1, 1], [], []>} : vector<384x128xf32>, vector<128x256xf32>, vector<384x256xf32> -> vector<384x256xf32>
    %12 = vector.broadcast %0 : vector<1x256xf32> to vector<384x256xf32>
    %13 = arith.addf %11, %12 : vector<384x256xf32>
    %cst_13 = arith.constant 0.000000e+00 : f32
    %14 = vector.broadcast %cst_13 : f32 to vector<384x256xf32>
    %15 = arith.maximumf %13, %14 : vector<384x256xf32>
    %16 = vector.extract_strided_slice %15 {offsets = [0, 0], sizes = [384, 128], strides = [1, 1]} : vector<384x256xf32> to vector<384x128xf32>
    %17 = vector.extract_strided_slice %15 {offsets = [0, 128], sizes = [384, 128], strides = [1, 1]} : vector<384x256xf32> to vector<384x128xf32>
    %18 = arith.maximumf %16, %17 : vector<384x128xf32>
    %19 = vector.extract_strided_slice %18 {offsets = [0, 0], sizes = [192, 128], strides = [1, 1]} : vector<384x128xf32> to vector<192x128xf32>
    %20 = vector.extract_strided_slice %18 {offsets = [192, 0], sizes = [192, 128], strides = [1, 1]} : vector<384x128xf32> to vector<192x128xf32>
    %21 = arith.maximumf %19, %20 : vector<192x128xf32>
    %cst_14 = arith.constant dense<0.000000e+00> : vector<128xf32>
    %22 = vector.multi_reduction <add>, %21, %cst_14 [0] : vector<192x128xf32> to vector<128xf32>
    %23 = vector.shape_cast %22 : vector<128xf32> to vector<1x128xf32>
    %24 = vector.extract_strided_slice %23 {offsets = [0, 0], sizes = [1, 8], strides = [1, 1]} : vector<1x128xf32> to vector<1x8xf32>
    %25 = vector.extract_strided_slice %23 {offsets = [0, 8], sizes = [1, 8], strides = [1, 1]} : vector<1x128xf32> to vector<1x8xf32>
    %26 = arith.addf %24, %25 : vector<1x8xf32>
    %27 = vector.extract_strided_slice %23 {offsets = [0, 16], sizes = [1, 8], strides = [1, 1]} : vector<1x128xf32> to vector<1x8xf32>
    %28 = arith.addf %26, %27 : vector<1x8xf32>
    %29 = vector.extract_strided_slice %23 {offsets = [0, 24], sizes = [1, 8], strides = [1, 1]} : vector<1x128xf32> to vector<1x8xf32>
    %30 = arith.addf %28, %29 : vector<1x8xf32>
    %31 = vector.extract_strided_slice %23 {offsets = [0, 32], sizes = [1, 8], strides = [1, 1]} : vector<1x128xf32> to vector<1x8xf32>
    %32 = arith.addf %30, %31 : vector<1x8xf32>
    %33 = vector.extract_strided_slice %23 {offsets = [0, 40], sizes = [1, 8], strides = [1, 1]} : vector<1x128xf32> to vector<1x8xf32>
    %34 = arith.addf %32, %33 : vector<1x8xf32>
    %cst_15 = arith.constant 8.68055562E-4 : f32
    %35 = vector.broadcast %cst_15 : f32 to vector<1x8xf32>
    %36 = arith.mulf %34, %35 : vector<1x8xf32>
    %37 = arith.mulf %21, %21 : vector<192x128xf32>
    %cst_16 = arith.constant dense<0.000000e+00> : vector<128xf32>
    %38 = vector.multi_reduction <add>, %37, %cst_16 [0] : vector<192x128xf32> to vector<128xf32>
    %39 = vector.shape_cast %38 : vector<128xf32> to vector<1x128xf32>
    %40 = vector.extract_strided_slice %39 {offsets = [0, 0], sizes = [1, 8], strides = [1, 1]} : vector<1x128xf32> to vector<1x8xf32>
    %41 = vector.extract_strided_slice %39 {offsets = [0, 8], sizes = [1, 8], strides = [1, 1]} : vector<1x128xf32> to vector<1x8xf32>
    %42 = arith.addf %40, %41 : vector<1x8xf32>
    %43 = vector.extract_strided_slice %39 {offsets = [0, 16], sizes = [1, 8], strides = [1, 1]} : vector<1x128xf32> to vector<1x8xf32>
    %44 = arith.addf %42, %43 : vector<1x8xf32>
    %45 = vector.extract_strided_slice %39 {offsets = [0, 24], sizes = [1, 8], strides = [1, 1]} : vector<1x128xf32> to vector<1x8xf32>
    %46 = arith.addf %44, %45 : vector<1x8xf32>
    %47 = vector.extract_strided_slice %39 {offsets = [0, 32], sizes = [1, 8], strides = [1, 1]} : vector<1x128xf32> to vector<1x8xf32>
    %48 = arith.addf %46, %47 : vector<1x8xf32>
    %49 = vector.extract_strided_slice %39 {offsets = [0, 40], sizes = [1, 8], strides = [1, 1]} : vector<1x128xf32> to vector<1x8xf32>
    %50 = arith.addf %48, %49 : vector<1x8xf32>
    %cst_17 = arith.constant 8.68055562E-4 : f32
    %51 = vector.broadcast %cst_17 : f32 to vector<1x8xf32>
    %52 = arith.mulf %50, %51 : vector<1x8xf32>
    %53 = arith.mulf %36, %36 : vector<1x8xf32>
    %54 = arith.subf %52, %53 : vector<1x8xf32>
    %cst_18 = arith.constant 9.99999974E-6 : f32
    %55 = vector.broadcast %cst_18 : f32 to vector<1x8xf32>
    %56 = arith.addf %54, %55 : vector<1x8xf32>
    %57 = math.rsqrt %56 : vector<1x8xf32>
    %58 = arith.mulf %57, %4 : vector<1x8xf32>
    %59 = arith.mulf %36, %58 : vector<1x8xf32>
    %60 = arith.subf %5, %59 : vector<1x8xf32>
    %cst_19 = arith.constant 0.000000e+00 : f32
    %61 = vector.broadcast %cst_19 : f32 to vector<1x80xf32>
    %62 = tpu.concatenate %58, %58, %58, %58, %58, %58, %61 in 1 : vector<1x8xf32>, vector<1x8xf32>, vector<1x8xf32>, vector<1x8xf32>, vector<1x8xf32>, vector<1x8xf32>, vector<1x80xf32> -> vector<1x128xf32>
    %63 = tpu.concatenate %60, %60, %60, %60, %60, %60, %61 in 1 : vector<1x8xf32>, vector<1x8xf32>, vector<1x8xf32>, vector<1x8xf32>, vector<1x8xf32>, vector<1x8xf32>, vector<1x80xf32> -> vector<1x128xf32>
    %64 = vector.broadcast %62 : vector<1x128xf32> to vector<192x128xf32>
    %65 = arith.mulf %21, %64 : vector<192x128xf32>
    %66 = vector.broadcast %63 : vector<1x128xf32> to vector<192x128xf32>
    %67 = arith.addf %65, %66 : vector<192x128xf32>
    %68 = vector.extract_strided_slice %67 {offsets = [0, 0], sizes = [64, 128], strides = [1, 1]} : vector<192x128xf32> to vector<64x128xf32>
    %c0_20 = arith.constant 0 : index
    %c0_21 = arith.constant 0 : index
    %69 = vector.load %arg2[%c0_20, %c0_21] : memref<640x32xf32, #tpu.memory_space<vmem>>, vector<128x32xf32>
    %cst_22 = arith.constant dense<0.000000e+00> : vector<64x32xf32>
    %70 = tpu.matmul %68, %69, %cst_22 {dimension_numbers = #tpu.dot_dimension_numbers<[1], [0], [0], [1], [0, 0, 1, 1], [], []>} : vector<64x128xf32>, vector<128x32xf32>, vector<64x32xf32> -> vector<64x32xf32>
    %71 = vector.extract_strided_slice %67 {offsets = [32, 0], sizes = [64, 128], strides = [1, 1]} : vector<192x128xf32> to vector<64x128xf32>
    %c128 = arith.constant 128 : index
    %c0_23 = arith.constant 0 : index
    %72 = vector.load %arg2[%c128, %c0_23] : memref<640x32xf32, #tpu.memory_space<vmem>>, vector<128x32xf32>
    %cst_24 = arith.constant dense<0.000000e+00> : vector<64x32xf32>
    %73 = tpu.matmul %71, %72, %cst_24 {dimension_numbers = #tpu.dot_dimension_numbers<[1], [0], [0], [1], [0, 0, 1, 1], [], []>} : vector<64x128xf32>, vector<128x32xf32>, vector<64x32xf32> -> vector<64x32xf32>
    %74 = arith.addf %70, %73 : vector<64x32xf32>
    %75 = vector.extract_strided_slice %67 {offsets = [64, 0], sizes = [64, 128], strides = [1, 1]} : vector<192x128xf32> to vector<64x128xf32>
    %c256 = arith.constant 256 : index
    %c0_25 = arith.constant 0 : index
    %76 = vector.load %arg2[%c256, %c0_25] : memref<640x32xf32, #tpu.memory_space<vmem>>, vector<128x32xf32>
    %cst_26 = arith.constant dense<0.000000e+00> : vector<64x32xf32>
    %77 = tpu.matmul %75, %76, %cst_26 {dimension_numbers = #tpu.dot_dimension_numbers<[1], [0], [0], [1], [0, 0, 1, 1], [], []>} : vector<64x128xf32>, vector<128x32xf32>, vector<64x32xf32> -> vector<64x32xf32>
    %78 = arith.addf %74, %77 : vector<64x32xf32>
    %79 = vector.extract_strided_slice %67 {offsets = [96, 0], sizes = [64, 128], strides = [1, 1]} : vector<192x128xf32> to vector<64x128xf32>
    %c384 = arith.constant 384 : index
    %c0_27 = arith.constant 0 : index
    %80 = vector.load %arg2[%c384, %c0_27] : memref<640x32xf32, #tpu.memory_space<vmem>>, vector<128x32xf32>
    %cst_28 = arith.constant dense<0.000000e+00> : vector<64x32xf32>
    %81 = tpu.matmul %79, %80, %cst_28 {dimension_numbers = #tpu.dot_dimension_numbers<[1], [0], [0], [1], [0, 0, 1, 1], [], []>} : vector<64x128xf32>, vector<128x32xf32>, vector<64x32xf32> -> vector<64x32xf32>
    %82 = arith.addf %78, %81 : vector<64x32xf32>
    %83 = vector.extract_strided_slice %67 {offsets = [128, 0], sizes = [64, 128], strides = [1, 1]} : vector<192x128xf32> to vector<64x128xf32>
    %c512 = arith.constant 512 : index
    %c0_29 = arith.constant 0 : index
    %84 = vector.load %arg2[%c512, %c0_29] : memref<640x32xf32, #tpu.memory_space<vmem>>, vector<128x32xf32>
    %cst_30 = arith.constant dense<0.000000e+00> : vector<64x32xf32>
    %85 = tpu.matmul %83, %84, %cst_30 {dimension_numbers = #tpu.dot_dimension_numbers<[1], [0], [0], [1], [0, 0, 1, 1], [], []>} : vector<64x128xf32>, vector<128x32xf32>, vector<64x32xf32> -> vector<64x32xf32>
    %86 = arith.addf %82, %85 : vector<64x32xf32>
    %87 = vector.broadcast %6 : vector<1x32xf32> to vector<64x32xf32>
    %88 = arith.addf %86, %87 : vector<64x32xf32>
    %cst_31 = arith.constant 0.000000e+00 : f32
    %89 = vector.broadcast %cst_31 : f32 to vector<64x32xf32>
    %90 = arith.maximumf %88, %89 : vector<64x32xf32>
    %91 = vector.extract_strided_slice %90 {offsets = [0, 0], sizes = [32, 32], strides = [1, 1]} : vector<64x32xf32> to vector<32x32xf32>
    %92 = vector.extract_strided_slice %90 {offsets = [32, 0], sizes = [32, 32], strides = [1, 1]} : vector<64x32xf32> to vector<32x32xf32>
    %93 = arith.maximumf %91, %92 : vector<32x32xf32>
    %94 = vector.extract_strided_slice %93 {offsets = [0, 0], sizes = [32, 16], strides = [1, 1]} : vector<32x32xf32> to vector<32x16xf32>
    %95 = vector.extract_strided_slice %93 {offsets = [0, 16], sizes = [32, 16], strides = [1, 1]} : vector<32x32xf32> to vector<32x16xf32>
    %96 = arith.maximumf %94, %95 : vector<32x16xf32>
    %97 = vector.extract_strided_slice %96 {offsets = [0, 0], sizes = [2, 16], strides = [1, 1]} : vector<32x16xf32> to vector<2x16xf32>
    %98 = vector.extract_strided_slice %96 {offsets = [2, 0], sizes = [2, 16], strides = [1, 1]} : vector<32x16xf32> to vector<2x16xf32>
    %99 = vector.extract_strided_slice %96 {offsets = [4, 0], sizes = [2, 16], strides = [1, 1]} : vector<32x16xf32> to vector<2x16xf32>
    %100 = vector.extract_strided_slice %96 {offsets = [6, 0], sizes = [2, 16], strides = [1, 1]} : vector<32x16xf32> to vector<2x16xf32>
    %101 = vector.extract_strided_slice %96 {offsets = [8, 0], sizes = [2, 16], strides = [1, 1]} : vector<32x16xf32> to vector<2x16xf32>
    %102 = vector.extract_strided_slice %96 {offsets = [10, 0], sizes = [2, 16], strides = [1, 1]} : vector<32x16xf32> to vector<2x16xf32>
    %103 = vector.extract_strided_slice %96 {offsets = [12, 0], sizes = [2, 16], strides = [1, 1]} : vector<32x16xf32> to vector<2x16xf32>
    %104 = vector.extract_strided_slice %96 {offsets = [14, 0], sizes = [2, 16], strides = [1, 1]} : vector<32x16xf32> to vector<2x16xf32>
    %105 = vector.extract_strided_slice %96 {offsets = [16, 0], sizes = [2, 16], strides = [1, 1]} : vector<32x16xf32> to vector<2x16xf32>
    %106 = vector.extract_strided_slice %96 {offsets = [18, 0], sizes = [2, 16], strides = [1, 1]} : vector<32x16xf32> to vector<2x16xf32>
    %107 = vector.extract_strided_slice %96 {offsets = [20, 0], sizes = [2, 16], strides = [1, 1]} : vector<32x16xf32> to vector<2x16xf32>
    %108 = vector.extract_strided_slice %96 {offsets = [22, 0], sizes = [2, 16], strides = [1, 1]} : vector<32x16xf32> to vector<2x16xf32>
    %109 = vector.extract_strided_slice %96 {offsets = [24, 0], sizes = [2, 16], strides = [1, 1]} : vector<32x16xf32> to vector<2x16xf32>
    %110 = vector.extract_strided_slice %96 {offsets = [26, 0], sizes = [2, 16], strides = [1, 1]} : vector<32x16xf32> to vector<2x16xf32>
    %111 = vector.extract_strided_slice %96 {offsets = [28, 0], sizes = [2, 16], strides = [1, 1]} : vector<32x16xf32> to vector<2x16xf32>
    %112 = vector.extract_strided_slice %96 {offsets = [30, 0], sizes = [2, 16], strides = [1, 1]} : vector<32x16xf32> to vector<2x16xf32>
    %113 = tpu.concatenate %97, %98, %99, %100, %101, %102, %103, %104, %105, %106, %107, %108, %109, %110, %111, %112 in 1 : vector<2x16xf32>, vector<2x16xf32>, vector<2x16xf32>, vector<2x16xf32>, vector<2x16xf32>, vector<2x16xf32>, vector<2x16xf32>, vector<2x16xf32>, vector<2x16xf32>, vector<2x16xf32>, vector<2x16xf32>, vector<2x16xf32>, vector<2x16xf32>, vector<2x16xf32>, vector<2x16xf32>, vector<2x16xf32> -> vector<2x256xf32>
    %cst_32 = arith.constant dense<0.000000e+00> : vector<256xf32>
    %114 = vector.multi_reduction <add>, %113, %cst_32 [0] : vector<2x256xf32> to vector<256xf32>
    %115 = vector.shape_cast %114 : vector<256xf32> to vector<1x256xf32>
    %cst_33 = arith.constant 5.000000e-01 : f32
    %116 = vector.broadcast %cst_33 : f32 to vector<1x256xf32>
    %117 = arith.mulf %115, %116 : vector<1x256xf32>
    %118 = vector.broadcast %117 : vector<1x256xf32> to vector<2x256xf32>
    %119 = arith.subf %113, %118 : vector<2x256xf32>
    %120 = arith.mulf %119, %119 : vector<2x256xf32>
    %cst_34 = arith.constant dense<0.000000e+00> : vector<256xf32>
    %121 = vector.multi_reduction <add>, %120, %cst_34 [0] : vector<2x256xf32> to vector<256xf32>
    %122 = vector.shape_cast %121 : vector<256xf32> to vector<1x256xf32>
    %cst_35 = arith.constant 5.000000e-01 : f32
    %123 = vector.broadcast %cst_35 : f32 to vector<1x256xf32>
    %124 = arith.mulf %122, %123 : vector<1x256xf32>
    %cst_36 = arith.constant 9.99999974E-6 : f32
    %125 = vector.broadcast %cst_36 : f32 to vector<1x256xf32>
    %126 = arith.addf %124, %125 : vector<1x256xf32>
    %127 = math.rsqrt %126 : vector<1x256xf32>
    %128 = vector.broadcast %127 : vector<1x256xf32> to vector<2x256xf32>
    %129 = arith.mulf %119, %128 : vector<2x256xf32>
    %130 = vector.broadcast %1 : vector<1x256xf32> to vector<2x256xf32>
    %131 = arith.mulf %129, %130 : vector<2x256xf32>
    %132 = vector.broadcast %2 : vector<1x256xf32> to vector<2x256xf32>
    %133 = arith.addf %131, %132 : vector<2x256xf32>
    %c0_37 = arith.constant 0 : index
    %c0_38 = arith.constant 0 : index
    %134 = vector.load %arg3[%c0_37, %c0_38] : memref<256x256xf32, #tpu.memory_space<vmem>>, vector<256x256xf32>
    %cst_39 = arith.constant dense<0.000000e+00> : vector<2x256xf32>
    %135 = tpu.matmul %133, %134, %cst_39 {dimension_numbers = #tpu.dot_dimension_numbers<[1], [0], [0], [1], [0, 0, 1, 1], [], []>} : vector<2x256xf32>, vector<256x256xf32>, vector<2x256xf32> -> vector<2x256xf32>
    %136 = vector.broadcast %3 : vector<1x256xf32> to vector<2x256xf32>
    %137 = arith.addf %135, %136 : vector<2x256xf32>
    %cst_40 = arith.constant 0.000000e+00 : f32
    %138 = vector.broadcast %cst_40 : f32 to vector<2x256xf32>
    %139 = arith.maximumf %137, %138 : vector<2x256xf32>
    %c0_41 = arith.constant 0 : index
    %c0_42 = arith.constant 0 : index
    %140 = vector.load %arg4[%c0_41, %c0_42] : memref<256x64xf32, #tpu.memory_space<vmem>>, vector<256x64xf32>
    %cst_43 = arith.constant dense<0.000000e+00> : vector<2x64xf32>
    %141 = tpu.matmul %139, %140, %cst_43 {dimension_numbers = #tpu.dot_dimension_numbers<[1], [0], [0], [1], [0, 0, 1, 1], [], []>} : vector<2x256xf32>, vector<256x64xf32>, vector<2x64xf32> -> vector<2x64xf32>
    %142 = vector.broadcast %7 : vector<1x64xf32> to vector<2x64xf32>
    %143 = arith.addf %141, %142 : vector<2x64xf32>
    %cst_44 = arith.constant 0.000000e+00 : f32
    %144 = vector.broadcast %cst_44 : f32 to vector<2x64xf32>
    %145 = arith.maximumf %143, %144 : vector<2x64xf32>
    %c0_45 = arith.constant 0 : index
    %c0_46 = arith.constant 0 : index
    %146 = vector.load %arg5[%c0_45, %c0_46] : memref<64x10xf32, #tpu.memory_space<vmem>>, vector<64x10xf32>
    %cst_47 = arith.constant dense<0.000000e+00> : vector<2x10xf32>
    %147 = tpu.matmul %145, %146, %cst_47 {dimension_numbers = #tpu.dot_dimension_numbers<[1], [0], [0], [1], [0, 0, 1, 1], [], []>} : vector<2x64xf32>, vector<64x10xf32>, vector<2x10xf32> -> vector<2x10xf32>
    %148 = vector.broadcast %8 : vector<1x10xf32> to vector<2x10xf32>
    %149 = arith.addf %147, %148 : vector<2x10xf32>
    %cst_48 = arith.constant dense<0xFF800000> : vector<2xf32>
    %150 = vector.multi_reduction <maximumf>, %149, %cst_48 [1] : vector<2x10xf32> to vector<2xf32>
    %151 = vector.shape_cast %150 : vector<2xf32> to vector<2x1xf32>
    %152 = vector.broadcast %151 : vector<2x1xf32> to vector<2x10xf32>
    %153 = arith.subf %149, %152 : vector<2x10xf32>
    %154 = math.exp %153 : vector<2x10xf32>
    %cst_49 = arith.constant dense<0.000000e+00> : vector<2xf32>
    %155 = vector.multi_reduction <add>, %154, %cst_49 [1] : vector<2x10xf32> to vector<2xf32>
    %156 = vector.shape_cast %155 : vector<2xf32> to vector<2x1xf32>
    %157 = vector.broadcast %156 : vector<2x1xf32> to vector<2x10xf32>
    %158 = arith.divf %154, %157 : vector<2x10xf32>
    %c0_50 = arith.constant 0 : index
    %c0_51 = arith.constant 0 : index
    %159 = vector.load %arg7[%c0_50, %c0_51] : memref<2x10xf32, #tpu.memory_space<vmem>>, vector<2x10xf32>
    tpu.vector_store %arg7[%c0_50, %c0_51], %158 {strides = array<i32>} : memref<2x10xf32, #tpu.memory_space<vmem>>, vector<2x10xf32>,
    return
  }
}

</mosaic_0001>

<bundles_post_ra>
// kernel: net_forward.1
= control target key start
LH: loop header
LB: loop body
LE: loop exit
PB: predicated region body
PF: predicated region fallthrough
CT: control target
= control target key end

     0   :  { %v2853_v7 = vmov 0.0   ;;  %s4334_s0 = inlined_call_operand.vmem [shape: f32[384,128], index: 0, kind: input, shape index: {}]   ;;  %s4335_s1 = inlined_call_operand.vmem [shape: f32[128,256], index: 1, kind: input, shape index: {}]   ;;  %s4336_s2 = inlined_call_operand.vmem [shape: f32[640,32], index: 2, kind: input, shape index: {}]   ;;  %s4337_s3 = inlined_call_operand.vmem [shape: f32[256,256], index: 3, kind: input, shape index: {}]   ;;  %s4338_s4 = inlined_call_operand.vmem [shape: f32[256,64], index: 4, kind: input, shape index: {}]   ;;  %s4339_s5 = inlined_call_operand.vmem [shape: f32[64,10], index: 5, kind: input, shape index: {}]   ;;  %s4340_s6 = inlined_call_operand.vmem [shape: f32[16,256], index: 6, kind: input, shape index: {}]   ;;  %s4341_s7 = inlined_call_operand.hbm [shape: f32[2,10], index: 7, kind: output, shape index: {}]  }
   0x1   :  { %v88_v0 = vld [vmem:[%s4335_s1 + $0x8] sm:$0xff]  ;;  %v90_v1 = vld [vmem:[%s4335_s1 + $0x18] sm:$0xff]  ;;  %v87_v2 = vld [vmem:[%s4335_s1] sm:$0xff]  ;;  %194 = vmatprep.mubr.f32.mxu0 %v2853_v7 }
   0x2   :  { %v2470_v3 = vpack.c.bf16 %v90_v1, %v88_v0  ;;  %v89_v4 = vld [vmem:[%s4335_s1 + $0x10] sm:$0xff]  ;;  %v92_v5 = vld [vmem:[%s4335_s1 + $0x28] sm:$0xff]  ;;  %v94_v6 = vld [vmem:[%s4335_s1 + $0x38] sm:$0xff] }
   0x3   :  { %v2472_v8 = vpack.c.bf16 %v89_v4, %v87_v2  ;;  %v2474_v9 = vpack.c.bf16 %v94_v6, %v92_v5  ;;  %v91_v10 = vld [vmem:[%s4335_s1 + $0x20] sm:$0xff]  ;;  %v93_v11 = vld [vmem:[%s4335_s1 + $0x30] sm:$0xff]  ;;  %v96_v12 = vld [vmem:[%s4335_s1 + $0x48] sm:$0xff] }
   0x4   :  { %2471 = vmatprep.subr.bf16.mxu0 %v2470_v3  ;;  %v98_v13 = vld [vmem:[%s4335_s1 + $0x58] sm:$0xff]  ;;  %v2476_v14 = vpack.c.bf16 %v93_v11, %v91_v10  ;;  %v95_v16 = vld [vmem:[%s4335_s1 + $0x40] sm:$0xff]  ;;  %v97_v17 = vld [vmem:[%s4335_s1 + $0x50] sm:$0xff] }
   0x5   :  { %2473 = vmatpush1.bf16.msra.mxu0 %v2472_v8  ;;  %v2478_v15 = vpack.c.bf16 %v98_v13, %v96_v12  ;;  %v100_v18 = vld [vmem:[%s4335_s1 + $0x68] sm:$0xff]  ;;  %v102_v19 = vld [vmem:[%s4335_s1 + $0x78] sm:$0xff]  ;;  %v2480_v20 = vpack.c.bf16 %v97_v17, %v95_v16  ;;  %v99_v22 = vld [vmem:[%s4335_s1 + $0x60] sm:$0xff] }
   0x6   :  { %2475 = vmatprep.subr.bf16.mxu0 %v2474_v9  ;;  %v2482_v21 = vpack.c.bf16 %v102_v19, %v100_v18  ;;  %v101_v23 = vld [vmem:[%s4335_s1 + $0x70] sm:$0xff]  ;;  %v104_v24 = vld [vmem:[%s4335_s1 + $0x88] sm:$0xff]  ;;  %v106_v25 = vld [vmem:[%s4335_s1 + $0x98] sm:$0xff] }
   0x7   :  { %v2484_v26 = vpack.c.bf16 %v101_v23, %v99_v22  ;;  %v2486_v27 = vpack.c.bf16 %v106_v25, %v104_v24  ;;  %v103_v28 = vld [vmem:[%s4335_s1 + $0x80] sm:$0xff]  ;;  %v105_v29 = vld [vmem:[%s4335_s1 + $0x90] sm:$0xff]  ;;  %v108_v30 = vld [vmem:[%s4335_s1 + $0xa8] sm:$0xff] }
   0x8   :  { %v110_v31 = vld [vmem:[%s4335_s1 + $0xb8] sm:$0xff]  ;;  %v2488_v32 = vpack.c.bf16 %v105_v29, %v103_v28  ;;  %v107_v34 = vld [vmem:[%s4335_s1 + $0xa0] sm:$0xff]  ;;  %v109_v35 = vld [vmem:[%s4335_s1 + $0xb0] sm:$0xff] }
   0x9   :  { %2477 = vmatpush1.bf16.msra.mxu0 %v2476_v14  ;;  %v2490_v33 = vpack.c.bf16 %v110_v31, %v108_v30  ;;  %v112_v36 = vld [vmem:[%s4335_s1 + $0xc8] sm:$0xff]  ;;  %v114_v37 = vld [vmem:[%s4335_s1 + $0xd8] sm:$0xff]  ;;  %v2492_v38 = vpack.c.bf16 %v109_v35, %v107_v34 }
   0xa   :  { %2479 = vmatprep.subr.bf16.mxu0 %v2478_v15 }
   0xd   :  { %2481 = vmatpush1.bf16.msra.mxu0 %v2480_v20 }
   0xe   :  { %2483 = vmatprep.subr.bf16.mxu0 %v2482_v21 }
  0x11   :  { %2485 = vmatpush1.bf16.msra.mxu0 %v2484_v26 }
  0x12   :  { %2487 = vmatprep.subr.bf16.mxu0 %v2486_v27 }
  0x15   :  { %2489 = vmatpush1.bf16.msra.mxu0 %v2488_v32 }
  0x16   :  { %12 = vsyncpa [#allocation3], 0  ;;  %2491 = vmatprep.subr.bf16.mxu0 %v2490_v33  ;;  %v2494_v39 = vpack.c.bf16 %v114_v37, %v112_v36  ;;  %v111_v40 = vld [vmem:[%s4335_s1 + $0xc0] sm:$0xff]  ;;  %v113_v41 = vld [vmem:[%s4335_s1 + $0xd0] sm:$0xff]  ;;  %v120_v34 = vlaneseq  ;;  %s2855_s21 = smov 120   ;;  %s2856_s22 = smov 96  }
  0x17   :  { %v116_v42 = vld [vmem:[%s4335_s1 + $0xe8] sm:$0xff]  ;;  %v118_v43 = vld [vmem:[%s4335_s1 + $0xf8] sm:$0xff]  ;;  %v2496_v44 = vpack.c.bf16 %v113_v41, %v111_v40  ;;  %v115_v46 = vld [vmem:[%s4335_s1 + $0xe0] sm:$0xff]  ;;  %s2857_s23 = smov 112   ;;  %s2859_s10 = smov 16   ;;  %vm800_vm0 = vcmask 64512  }
  0x18   :  { %v2498_v45 = vpack.c.bf16 %v118_v43, %v116_v42  ;;  %v117_v47 = vld [vmem:[%s4335_s1 + $0xf0] sm:$0xff]  ;;  %v39_v49 = vld [vmem:[%s4334_s0] sm:$0xff]  ;;  %v40_v50 = vld [vmem:[%s4334_s0 + $0x8] sm:$0xff]  ;;  %v121_v35 = vshrl.u32 %v120_v34, 7  ;;  %s2858_s1 = smov 88   ;;  %s2860_s11 = smov 8  }
  0x19   :  { %2493 = vmatpush1.bf16.msra.mxu0 %v2492_v38  ;;  %v2500_v48 = vpack.c.bf16 %v117_v47, %v115_v46  ;;  %v41_v51 = vld [vmem:[%s4334_s0 + $0x10] sm:$0xff]  ;;  %v42_v52 = vld [vmem:[%s4334_s0 + $0x18] sm:$0xff]  ;;  %v43_v53 = vld [vmem:[%s4334_s0 + $0x20] sm:$0xff]  ;;  %s2861_s16 = smov 24   ;;  %vm802_vm1 = vcmask 130048   ;;  %vm804_vm2 = vcmask 195584  }
  0x1a   :  { %2495 = vmatprep.subr.bf16.mxu0 %v2494_v39  ;;  %v44_v54 = vld [vmem:[%s4334_s0 + $0x28] sm:$0xff]  ;;  %v45_v55 = vld [vmem:[%s4334_s0 + $0x30] sm:$0xff]  ;;  %v46_v56 = vld [vmem:[%s4334_s0 + $0x38] sm:$0xff]  ;;  %v3198_v36 = vsub.s32 0, %v121_v35  ;;  %v3203_v38 = vsub.s32 1, %v121_v35  ;;  %vm806_vm3 = vcmask 261120  }
  0x1b   :  { %v47_v57 = vld [vmem:[%s4334_s0 + $0x40] sm:$0xff]  ;;  %v48_v58 = vld [vmem:[%s4334_s0 + $0x48] sm:$0xff]  ;;  %v49_v59 = vld [vmem:[%s4334_s0 + $0x50] sm:$0xff]  ;;  %vm808_vm4 = vcmask 326656   ;;  %vm810_vm5 = vcmask 392192   ;;  %s2866_s9 = smov 48  }
  0x1c   :  { %v50_v60 = vld [vmem:[%s4334_s0 + $0x58] sm:$0xff]  ;;  %v51_v61 = vld [vmem:[%s4334_s0 + $0x60] sm:$0xff]  ;;  %v52_v62 = vld [vmem:[%s4334_s0 + $0x68] sm:$0xff]  ;;  %vm1620_vm6 = vcmask 523264   ;;  %vm1622_vm7 = vcmask 654336   ;;  %vm1624_vm8 = vcmask 785408  }
  0x1d   :  { %2497 = vmatpush1.bf16.msra.mxu0 %v2496_v44  ;;  %v53_v63 = vld [vmem:[%s4334_s0 + $0x70] sm:$0xff]  ;;  %v54_v0 = vld [vmem:[%s4334_s0 + $0x78] sm:$0xff]  ;;  %v55_v1 = vld [vmem:[%s4334_s0 + $0x80] sm:$0xff]  ;;  %vm1626_vm9 = vcmask 916480   ;;  %vm1635_vm10 = vcmask 1041408   ;;  %vm2868_vm11 = vmmov 0  }
  0x1e   :  { %2499 = vmatprep.subr.bf16.mxu0 %v2498_v45  ;;  %v56_v2 = vld [vmem:[%s4334_s0 + $0x88] sm:$0xff]  ;;  %v57_v3 = vld [vmem:[%s4334_s0 + $0x90] sm:$0xff]  ;;  %v58_v4 = vld [vmem:[%s4334_s0 + $0x98] sm:$0xff]  ;;  %vm2036_vm12 = vcmask 74752  }
  0x1f   :  { %v59_v5 = vld [vmem:[%s4334_s0 + $0xa0] sm:$0xff]  ;;  %v60_v6 = vld [vmem:[%s4334_s0 + $0xa8] sm:$0xff]  ;;  %v61_v8 = vld [vmem:[%s4334_s0 + $0xb0] sm:$0xff] }
  0x20   :  { %v62_v9 = vld [vmem:[%s4334_s0 + $0xb8] sm:$0xff]  ;;  %v63_v10 = vld [vmem:[%s4334_s0 + $0xc0] sm:$0xff]  ;;  %v64_v11 = vld [vmem:[%s4334_s0 + $0xc8] sm:$0xff] }
  0x21   :  { %2501 = vmatpush1.bf16.msra.mxu0 %v2500_v48  ;;  %v65_v12 = vld [vmem:[%s4334_s0 + $0xd0] sm:$0xff]  ;;  %v66_v13 = vld [vmem:[%s4334_s0 + $0xd8] sm:$0xff]  ;;  %v67_v14 = vld [vmem:[%s4334_s0 + $0xe0] sm:$0xff] }
  0x22   :  { %v68_v15 = vld [vmem:[%s4334_s0 + $0xe8] sm:$0xff]  ;;  %v69_v16 = vld [vmem:[%s4334_s0 + $0xf0] sm:$0xff]  ;;  %v70_v17 = vld [vmem:[%s4334_s0 + $0xf8] sm:$0xff] }
  0x23   :  { %v71_v18 = vld [vmem:[%s4334_s0 + $0x100] sm:$0xff]  ;;  %v72_v19 = vld [vmem:[%s4334_s0 + $0x108] sm:$0xff]  ;;  %v73_v20 = vld [vmem:[%s4334_s0 + $0x110] sm:$0xff] }
  0x24   :  { %195 = vmatmul.mubr.f32.vlgmr.msra.gmra.mrb[0].mxu0 %v39_v49  ;;  %v74_v21 = vld [vmem:[%s4334_s0 + $0x118] sm:$0xff]  ;;  %v75_v22 = vld [vmem:[%s4334_s0 + $0x120] sm:$0xff]  ;;  %v76_v23 = vld [vmem:[%s4334_s0 + $0x128] sm:$0xff] }
  0x25   :  { %200 = vmatprep.mubr.f32.mxu0 %v2853_v7  ;;  %v77_v24 = vld [vmem:[%s4334_s0 + $0x130] sm:$0xff]  ;;  %v78_v25 = vld [vmem:[%s4334_s0 + $0x138] sm:$0xff]  ;;  %v79_v26 = vld [vmem:[%s4334_s0 + $0x140] sm:$0xff] }
  0x26   :  { %v80_v27 = vld [vmem:[%s4334_s0 + $0x148] sm:$0xff]  ;;  %v81_v28 = vld [vmem:[%s4334_s0 + $0x150] sm:$0xff]  ;;  %v82_v29 = vld [vmem:[%s4334_s0 + $0x158] sm:$0xff] }
  0x27   :  { %v83_v30 = vld [vmem:[%s4334_s0 + $0x160] sm:$0xff]  ;;  %v84_v31 = vld [vmem:[%s4334_s0 + $0x168] sm:$0xff]  ;;  %v85_v32 = vld [vmem:[%s4334_s0 + $0x170] sm:$0xff] }
  0x28   :  { %201 = vmatmul.mubr.f32.gmra.mrb[2].mxu0 %v40_v50  ;;  %v86_v33 = vld [vmem:[%s4334_s0 + $0x178] sm:$0xff]  ;;  %v27_v37 = vld [vmem:[%s4340_s6] ss:$8 sm:$0x3]  ;;  %s2854_s0 = smov 104  }
  0x29   :  { %206 = vmatprep.mubr.f32.mxu0 %v2853_v7  ;;  %v3206_v39 = vrot.slane %v27_v37, %v3198_v36  ;;  %v3209_v40 = vrot.slane %v27_v37, %v3203_v38 }
  0x2c   :  { %207 = vmatmul.mubr.f32.gmra.mrb[4].mxu0 %v41_v51 }
  0x2d   :  { %212 = vmatprep.mubr.f32.mxu0 %v2853_v7 }
  0x30   :  { %213 = vmatmul.mubr.f32.gmra.mrb[6].mxu0 %v42_v52 }
  0x31   :  { %218 = vmatprep.mubr.f32.mxu0 %v2853_v7 }
  0x34   :  { %219 = vmatmul.mubr.f32.gmra.mrb[8].mxu0 %v43_v53 }
  0x35   :  { %224 = vmatprep.mubr.f32.mxu0 %v2853_v7 }
  0x38   :  { %225 = vmatmul.mubr.f32.gmra.mrb[10].mxu0 %v44_v54 }
  0x39   :  { %230 = vmatprep.mubr.f32.mxu0 %v2853_v7 }
  0x3c   :  { %231 = vmatmul.mubr.f32.gmra.mrb[12].mxu0 %v45_v55 }
  0x3d   :  { %236 = vmatprep.mubr.f32.mxu0 %v2853_v7 }
  0x40   :  { %237 = vmatmul.mubr.f32.gmra.mrb[14].mxu0 %v46_v56 }
  0x41   :  { %242 = vmatprep.mubr.f32.mxu0 %v2853_v7 }
  0x44   :  { %243 = vmatmul.mubr.f32.gmra.mrb[16].mxu0 %v47_v57 }
  0x45   :  { %248 = vmatprep.mubr.f32.mxu0 %v2853_v7 }
  0x48   :  { %249 = vmatmul.mubr.f32.gmra.mrb[18].mxu0 %v48_v58 }
  0x49   :  { %254 = vmatprep.mubr.f32.mxu0 %v2853_v7 }
  0x4c   :  { %255 = vmatmul.mubr.f32.gmra.mrb[20].mxu0 %v49_v59 }
  0x4d   :  { %260 = vmatprep.mubr.f32.mxu0 %v2853_v7 }
  0x50   :  { %261 = vmatmul.mubr.f32.gmra.mrb[22].mxu0 %v50_v60 }
  0x51   :  { %266 = vmatprep.mubr.f32.mxu0 %v2853_v7 }
  0x54   :  { %267 = vmatmul.mubr.f32.gmra.mrb[24].mxu0 %v51_v61 }
  0x55   :  { %272 = vmatprep.mubr.f32.mxu0 %v2853_v7 }
  0x58   :  { %273 = vmatmul.mubr.f32.gmra.mrb[26].mxu0 %v52_v62 }
  0x59   :  { %278 = vmatprep.mubr.f32.mxu0 %v2853_v7 }
  0x5c   :  { %279 = vmatmul.mubr.f32.gmra.mrb[28].mxu0 %v53_v63 }
  0x5d   :  { %284 = vmatprep.mubr.f32.mxu0 %v2853_v7 }
  0x60   :  { %285 = vmatmul.mubr.f32.gmra.mrb[30].mxu0 %v54_v0 }
  0x61   :  { %290 = vmatprep.mubr.f32.mxu0 %v2853_v7 }
  0x64   :  { %291 = vmatmul.mubr.f32.gmra.mrb[32].mxu0 %v55_v1 }
  0x65   :  { %296 = vmatprep.mubr.f32.mxu0 %v2853_v7 }
  0x68   :  { %297 = vmatmul.mubr.f32.gmra.mrb[34].mxu0 %v56_v2 }
  0x69   :  { %302 = vmatprep.mubr.f32.mxu0 %v2853_v7 }
  0x6c   :  { %303 = vmatmul.mubr.f32.gmra.mrb[36].mxu0 %v57_v3 }
  0x6d   :  { %308 = vmatprep.mubr.f32.mxu0 %v2853_v7 }
  0x70   :  { %309 = vmatmul.mubr.f32.gmra.mrb[38].mxu0 %v58_v4 }
  0x71   :  { %314 = vmatprep.mubr.f32.mxu0 %v2853_v7 }
  0x74   :  { %315 = vmatmul.mubr.f32.gmra.mrb[40].mxu0 %v59_v5 }
  0x75   :  { %320 = vmatprep.mubr.f32.mxu0 %v2853_v7 }
  0x78   :  { %321 = vmatmul.mubr.f32.gmra.mrb[42].mxu0 %v60_v6 }
  0x79   :  { %326 = vmatprep.mubr.f32.mxu0 %v2853_v7 }
  0x7c   :  { %327 = vmatmul.mubr.f32.gmra.mrb[44].mxu0 %v61_v8 }
  0x7d   :  { %332 = vmatprep.mubr.f32.mxu0 %v2853_v7 }
  0x80   :  { %333 = vmatmul.mubr.f32.gmra.mrb[46].mxu0 %v62_v9 }
  0x81   :  { %338 = vmatprep.mubr.f32.mxu0 %v2853_v7 }
  0x84   :  { %339 = vmatmul.mubr.f32.gmra.mrb[48].mxu0 %v63_v10 }
  0x85   :  { %344 = vmatprep.mubr.f32.mxu0 %v2853_v7 }
  0x88   :  { %345 = vmatmul.mubr.f32.gmra.mrb[50].mxu0 %v64_v11 }
  0x89   :  { %350 = vmatprep.mubr.f32.mxu0 %v2853_v7 }
  0x8c   :  { %351 = vmatmul.mubr.f32.gmra.mrb[52].mxu0 %v65_v12 }
  0x8d   :  { %356 = vmatprep.mubr.f32.mxu0 %v2853_v7 }
  0x90   :  { %357 = vmatmul.mubr.f32.gmra.mrb[54].mxu0 %v66_v13 }
  0x91   :  { %362 = vmatprep.mubr.f32.mxu0 %v2853_v7 }
  0x94   :  { %363 = vmatmul.mubr.f32.gmra.mrb[56].mxu0 %v67_v14 }
  0x95   :  { %368 = vmatprep.mubr.f32.mxu0 %v2853_v7 }
  0x98   :  { %369 = vmatmul.mubr.f32.gmra.mrb[58].mxu0 %v68_v15 }
  0x99   :  { %374 = vmatprep.mubr.f32.mxu0 %v2853_v7 }
  0x9c   :  { %375 = vmatmul.mubr.f32.gmra.mrb[60].mxu0 %v69_v16 }
  0x9d   :  { %380 = vmatprep.mubr.f32.mxu0 %v2853_v7 }
  0xa0   :  { %381 = vmatmul.mubr.f32.gmra.mrb[62].mxu0 %v70_v17 }
  0xa1   :  { %386 = vmatprep.mubr.f32.mxu0 %v2853_v7 }
  0xa4   :  { %387 = vmatmul.mubr.f32.gmra.mrb[64].mxu0 %v71_v18 }
  0xa5   :  { %392 = vmatprep.mubr.f32.mxu0 %v2853_v7 }
  0xa8   :  { %393 = vmatmul.mubr.f32.gmra.mrb[66].mxu0 %v72_v19 }
  0xa9   :  { %398 = vmatprep.mubr.f32.mxu0 %v2853_v7 }
  0xac   :  { %399 = vmatmul.mubr.f32.gmra.mrb[68].mxu0 %v73_v20 }
  0xad   :  { %404 = vmatprep.mubr.f32.mxu0 %v2853_v7 }
  0xb0   :  { %405 = vmatmul.mubr.f32.gmra.mrb[70].mxu0 %v74_v21 }
  0xb1   :  { %410 = vmatprep.mubr.f32.mxu0 %v2853_v7 }
  0xb4   :  { %411 = vmatmul.mubr.f32.gmra.mrb[72].mxu0 %v75_v22 }
  0xb5   :  { %416 = vmatprep.mubr.f32.mxu0 %v2853_v7 }
  0xb8   :  { %417 = vmatmul.mubr.f32.gmra.mrb[74].mxu0 %v76_v23 }
  0xb9   :  { %422 = vmatprep.mubr.f32.mxu0 %v2853_v7 }
  0xbc   :  { %423 = vmatmul.mubr.f32.gmra.mrb[76].mxu0 %v77_v24 }
  0xbd   :  { %428 = vmatprep.mubr.f32.mxu0 %v2853_v7 }
  0xc0   :  { %429 = vmatmul.mubr.f32.gmra.mrb[78].mxu0 %v78_v25 }
  0xc1   :  { %434 = vmatprep.mubr.f32.mxu0 %v2853_v7 }
  0xc4   :  { %435 = vmatmul.mubr.f32.gmra.mrb[80].mxu0 %v79_v26 }
  0xc5   :  { %440 = vmatprep.mubr.f32.mxu0 %v2853_v7 }
  0xc8   :  { %441 = vmatmul.mubr.f32.gmra.mrb[82].mxu0 %v80_v27 }
  0xc9   :  { %446 = vmatprep.mubr.f32.mxu0 %v2853_v7 }
  0xcc   :  { %447 = vmatmul.mubr.f32.gmra.mrb[84].mxu0 %v81_v28 }
  0xcd   :  { %452 = vmatprep.mubr.f32.mxu0 %v2853_v7 }
  0xd0   :  { %453 = vmatmul.mubr.f32.gmra.mrb[86].mxu0 %v82_v29 }
  0xd1   :  { %458 = vmatprep.mubr.f32.mxu0 %v2853_v7 }
  0xd4   :  { %459 = vmatmul.mubr.f32.gmra.mrb[88].mxu0 %v83_v30 }
  0xd5   :  { %464 = vmatprep.mubr.f32.mxu0 %v2853_v7 }
  0xd8   :  { %465 = vmatmul.mubr.f32.gmra.mrb[90].mxu0 %v84_v31 }
  0xd9   :  { %470 = vmatprep.mubr.f32.mxu0 %v2853_v7 }
  0xdc   :  { %471 = vmatmul.mubr.f32.gmra.mrb[92].mxu0 %v85_v32 }
  0xdd   :  { %476 = vmatprep.mubr.f32.mxu0 %v2853_v7 }
  0xe0   :  { %477 = vmatmul.mubr.f32.gmra.mrb[94].mxu0 %v86_v33 }
  0xf7   :  { %v196_v41 = vpop.f32.mrb[0].mxu0 }
  0xf8   :  { %v197_v42 = vadd.f32 %v196_v41, %v3206_v39  ;;  %v198_v43 = vpop.f32.mrb[1].mxu0 }
  0xf9   :  { %v199_v44 = vadd.f32 %v198_v43, %v3209_v40 }
  0xfa   :  { %v483_v45 = vmax.f32 %v197_v42, 0.0 }
  0xfb   :  { %v484_v46 = vmax.f32 %v199_v44, 0.0  ;;  %v202_v47 = vpop.f32.mrb[2].mxu0 }
  0xfc   :  { %v203_v48 = vadd.f32 %v202_v47, %v3206_v39  ;;  %v204_v49 = vpop.f32.mrb[3].mxu0 }
  0xfd   :  { %v3214_v50 = vmax.f32 %v483_v45, %v484_v46  ;;  %v205_v51 = vadd.f32 %v204_v49, %v3209_v40 }
  0xfe   :  { %v485_v52 = vmax.f32 %v203_v48, 0.0 }
  0xff   :  { %v486_v53 = vmax.f32 %v205_v51, 0.0  ;;  %v208_v54 = vpop.f32.mrb[4].mxu0 }
 0x100   :  { %v209_v55 = vadd.f32 %v208_v54, %v3206_v39  ;;  %v210_v56 = vpop.f32.mrb[5].mxu0 }
 0x101   :  { %v3218_v57 = vmax.f32 %v485_v52, %v486_v53  ;;  %v211_v58 = vadd.f32 %v210_v56, %v3209_v40 }
 0x102   :  { %v487_v59 = vmax.f32 %v209_v55, 0.0 }
 0x103   :  { %v488_v60 = vmax.f32 %v211_v58, 0.0  ;;  %v214_v61 = vpop.f32.mrb[6].mxu0 }
 0x104   :  { %v215_v62 = vadd.f32 %v214_v61, %v3206_v39  ;;  %v216_v63 = vpop.f32.mrb[7].mxu0 }
 0x105   :  { %v3222_v0 = vmax.f32 %v487_v59, %v488_v60  ;;  %v217_v1 = vadd.f32 %v216_v63, %v3209_v40 }
 0x106   :  { %v489_v2 = vmax.f32 %v215_v62, 0.0 }
 0x107   :  { %v490_v3 = vmax.f32 %v217_v1, 0.0  ;;  %v220_v4 = vpop.f32.mrb[8].mxu0 }
 0x108   :  { %v221_v5 = vadd.f32 %v220_v4, %v3206_v39  ;;  %v222_v6 = vpop.f32.mrb[9].mxu0 }
 0x109   :  { %v3226_v8 = vmax.f32 %v489_v2, %v490_v3  ;;  %v223_v9 = vadd.f32 %v222_v6, %v3209_v40 }
 0x10a   :  { %v491_v10 = vmax.f32 %v221_v5, 0.0 }
 0x10b   :  { %v492_v11 = vmax.f32 %v223_v9, 0.0  ;;  %v226_v12 = vpop.f32.mrb[10].mxu0 }
 0x10c   :  { %v227_v13 = vadd.f32 %v226_v12, %v3206_v39  ;;  %v228_v14 = vpop.f32.mrb[11].mxu0 }
 0x10d   :  { %v3230_v15 = vmax.f32 %v491_v10, %v492_v11  ;;  %v229_v16 = vadd.f32 %v228_v14, %v3209_v40 }
 0x10e   :  { %v493_v17 = vmax.f32 %v227_v13, 0.0 }
 0x10f   :  { %v494_v18 = vmax.f32 %v229_v16, 0.0  ;;  %v232_v19 = vpop.f32.mrb[12].mxu0 }
 0x110   :  { %v233_v20 = vadd.f32 %v232_v19, %v3206_v39  ;;  %v234_v21 = vpop.f32.mrb[13].mxu0 }
 0x111   :  { %v3234_v22 = vmax.f32 %v493_v17, %v494_v18  ;;  %v235_v23 = vadd.f32 %v234_v21, %v3209_v40 }
 0x112   :  { %v495_v24 = vmax.f32 %v233_v20, 0.0 }
 0x113   :  { %v496_v25 = vmax.f32 %v235_v23, 0.0  ;;  %v238_v26 = vpop.f32.mrb[14].mxu0 }
 0x114   :  { %v239_v27 = vadd.f32 %v238_v26, %v3206_v39  ;;  %v240_v28 = vpop.f32.mrb[15].mxu0 }
 0x115   :  { %v3238_v29 = vmax.f32 %v495_v24, %v496_v25  ;;  %v241_v30 = vadd.f32 %v240_v28, %v3209_v40 }
 0x116   :  { %v497_v31 = vmax.f32 %v239_v27, 0.0 }
 0x117   :  { %v498_v32 = vmax.f32 %v241_v30, 0.0  ;;  %v244_v33 = vpop.f32.mrb[16].mxu0 }
 0x118   :  { %v245_v34 = vadd.f32 %v244_v33, %v3206_v39  ;;  %v246_v35 = vpop.f32.mrb[17].mxu0 }
 0x119   :  { %v3242_v37 = vmax.f32 %v497_v31, %v498_v32  ;;  %v247_v41 = vadd.f32 %v246_v35, %v3209_v40 }
 0x11a   :  { %v499_v42 = vmax.f32 %v245_v34, 0.0 }
 0x11b   :  { %v500_v43 = vmax.f32 %v247_v41, 0.0  ;;  %v250_v44 = vpop.f32.mrb[18].mxu0 }
 0x11c   :  { %v251_v45 = vadd.f32 %v250_v44, %v3206_v39  ;;  %v252_v46 = vpop.f32.mrb[19].mxu0 }
 0x11d   :  { %v3246_v47 = vmax.f32 %v499_v42, %v500_v43  ;;  %v253_v48 = vadd.f32 %v252_v46, %v3209_v40 }
 0x11e   :  { %v501_v49 = vmax.f32 %v251_v45, 0.0 }
 0x11f   :  { %v502_v51 = vmax.f32 %v253_v48, 0.0  ;;  %v256_v52 = vpop.f32.mrb[20].mxu0 }
 0x120   :  { %v257_v53 = vadd.f32 %v256_v52, %v3206_v39  ;;  %v258_v54 = vpop.f32.mrb[21].mxu0 }
 0x121   :  { %v3250_v55 = vmax.f32 %v501_v49, %v502_v51  ;;  %v259_v56 = vadd.f32 %v258_v54, %v3209_v40 }
 0x122   :  { %v503_v58 = vmax.f32 %v257_v53, 0.0 }
 0x123   :  { %v504_v59 = vmax.f32 %v259_v56, 0.0  ;;  %v262_v60 = vpop.f32.mrb[22].mxu0 }
 0x124   :  { %v263_v61 = vadd.f32 %v262_v60, %v3206_v39  ;;  %v264_v62 = vpop.f32.mrb[23].mxu0 }
 0x125   :  { %v3254_v63 = vmax.f32 %v503_v58, %v504_v59  ;;  %v265_v1 = vadd.f32 %v264_v62, %v3209_v40 }
 0x126   :  { %v505_v2 = vmax.f32 %v263_v61, 0.0 }
 0x127   :  { %v506_v3 = vmax.f32 %v265_v1, 0.0  ;;  %v268_v4 = vpop.f32.mrb[24].mxu0 }
 0x128   :  { %v269_v5 = vadd.f32 %v268_v4, %v3206_v39  ;;  %v270_v6 = vpop.f32.mrb[25].mxu0 }
 0x129   :  { %v3258_v9 = vmax.f32 %v505_v2, %v506_v3  ;;  %v271_v10 = vadd.f32 %v270_v6, %v3209_v40 }
 0x12a   :  { %v507_v11 = vmax.f32 %v269_v5, 0.0 }
 0x12b   :  { %v508_v12 = vmax.f32 %v271_v10, 0.0  ;;  %v274_v13 = vpop.f32.mrb[26].mxu0 }
 0x12c   :  { %v275_v14 = vadd.f32 %v274_v13, %v3206_v39  ;;  %v276_v16 = vpop.f32.mrb[27].mxu0 }
 0x12d   :  { %v3262_v17 = vmax.f32 %v507_v11, %v508_v12  ;;  %v277_v18 = vadd.f32 %v276_v16, %v3209_v40 }
 0x12e   :  { %v509_v19 = vmax.f32 %v275_v14, 0.0 }
 0x12f   :  { %v510_v20 = vmax.f32 %v277_v18, 0.0  ;;  %v280_v21 = vpop.f32.mrb[28].mxu0 }
 0x130   :  { %v281_v23 = vadd.f32 %v280_v21, %v3206_v39  ;;  %v282_v24 = vpop.f32.mrb[29].mxu0 }
 0x131   :  { %v3266_v25 = vmax.f32 %v509_v19, %v510_v20  ;;  %v283_v26 = vadd.f32 %v282_v24, %v3209_v40 }
 0x132   :  { %v511_v27 = vmax.f32 %v281_v23, 0.0 }
 0x133   :  { %v512_v28 = vmax.f32 %v283_v26, 0.0  ;;  %v286_v30 = vpop.f32.mrb[30].mxu0 }
 0x134   :  { %v287_v31 = vadd.f32 %v286_v30, %v3206_v39  ;;  %v288_v32 = vpop.f32.mrb[31].mxu0 }
 0x135   :  { %v3270_v33 = vmax.f32 %v511_v27, %v512_v28  ;;  %v289_v34 = vadd.f32 %v288_v32, %v3209_v40 }
 0x136   :  { %v513_v35 = vmax.f32 %v287_v31, 0.0 }
 0x137   :  { %v514_v41 = vmax.f32 %v289_v34, 0.0  ;;  %v292_v42 = vpop.f32.mrb[32].mxu0 }
 0x138   :  { %v293_v43 = vadd.f32 %v292_v42, %v3206_v39  ;;  %v294_v44 = vpop.f32.mrb[33].mxu0 }
 0x139   :  { %v3274_v45 = vmax.f32 %v513_v35, %v514_v41  ;;  %v295_v46 = vadd.f32 %v294_v44, %v3209_v40 }
 0x13a   :  { %v515_v48 = vmax.f32 %v293_v43, 0.0 }
 0x13b   :  { %v516_v49 = vmax.f32 %v295_v46, 0.0  ;;  %v298_v51 = vpop.f32.mrb[34].mxu0 }
 0x13c   :  { %v299_v52 = vadd.f32 %v298_v51, %v3206_v39  ;;  %v300_v53 = vpop.f32.mrb[35].mxu0 }
 0x13d   :  { %v3278_v54 = vmax.f32 %v515_v48, %v516_v49  ;;  %v301_v56 = vadd.f32 %v300_v53, %v3209_v40 }
 0x13e   :  { %v517_v58 = vmax.f32 %v299_v52, 0.0 }
 0x13f   :  { %v518_v59 = vmax.f32 %v301_v56, 0.0  ;;  %v304_v60 = vpop.f32.mrb[36].mxu0 }
 0x140   :  { %v305_v61 = vadd.f32 %v304_v60, %v3206_v39  ;;  %v306_v62 = vpop.f32.mrb[37].mxu0 }
 0x141   :  { %v3282_v1 = vmax.f32 %v517_v58, %v518_v59  ;;  %v307_v2 = vadd.f32 %v306_v62, %v3209_v40 }
 0x142   :  { %v519_v3 = vmax.f32 %v305_v61, 0.0 }
 0x143   :  { %v520_v4 = vmax.f32 %v307_v2, 0.0  ;;  %v310_v5 = vpop.f32.mrb[38].mxu0 }
 0x144   :  { %v311_v6 = vadd.f32 %v310_v5, %v3206_v39  ;;  %v312_v10 = vpop.f32.mrb[39].mxu0 }
 0x145   :  { %v3286_v11 = vmax.f32 %v519_v3, %v520_v4  ;;  %v313_v12 = vadd.f32 %v312_v10, %v3209_v40 }
 0x146   :  { %v521_v13 = vmax.f32 %v311_v6, 0.0 }
 0x147   :  { %v522_v14 = vmax.f32 %v313_v12, 0.0  ;;  %v316_v16 = vpop.f32.mrb[40].mxu0 }
 0x148   :  { %v317_v18 = vadd.f32 %v316_v16, %v3206_v39  ;;  %v318_v19 = vpop.f32.mrb[41].mxu0 }
 0x149   :  { %v3290_v20 = vmax.f32 %v521_v13, %v522_v14  ;;  %v319_v21 = vadd.f32 %v318_v19, %v3209_v40 }
 0x14a   :  { %v523_v23 = vmax.f32 %v317_v18, 0.0 }
 0x14b   :  { %v524_v24 = vmax.f32 %v319_v21, 0.0  ;;  %v322_v26 = vpop.f32.mrb[42].mxu0 }
 0x14c   :  { %v323_v27 = vadd.f32 %v322_v26, %v3206_v39  ;;  %v324_v28 = vpop.f32.mrb[43].mxu0 }
 0x14d   :  { %v3294_v30 = vmax.f32 %v523_v23, %v524_v24  ;;  %v325_v31 = vadd.f32 %v324_v28, %v3209_v40 }
 0x14e   :  { %v525_v32 = vmax.f32 %v323_v27, 0.0 }
 0x14f   :  { %v526_v34 = vmax.f32 %v325_v31, 0.0  ;;  %v328_v35 = vpop.f32.mrb[44].mxu0 }
 0x150   :  { %v329_v41 = vadd.f32 %v328_v35, %v3206_v39  ;;  %v330_v42 = vpop.f32.mrb[45].mxu0 }
 0x151   :  { %v3298_v43 = vmax.f32 %v525_v32, %v526_v34  ;;  %v331_v44 = vadd.f32 %v330_v42, %v3209_v40 }
 0x152   :  { %v527_v46 = vmax.f32 %v329_v41, 0.0 }
 0x153   :  { %v528_v48 = vmax.f32 %v331_v44, 0.0  ;;  %v334_v49 = vpop.f32.mrb[46].mxu0 }
 0x154   :  { %v335_v51 = vadd.f32 %v334_v49, %v3206_v39  ;;  %v336_v52 = vpop.f32.mrb[47].mxu0 }
 0x155   :  { %v3302_v53 = vmax.f32 %v527_v46, %v528_v48  ;;  %v337_v56 = vadd.f32 %v336_v52, %v3209_v40 }
 0x156   :  { %v529_v58 = vmax.f32 %v335_v51, 0.0 }
 0x157   :  { %v530_v59 = vmax.f32 %v337_v56, 0.0  ;;  %v340_v60 = vpop.f32.mrb[48].mxu0 }
 0x158   :  { %v341_v61 = vadd.f32 %v340_v60, %v3206_v39  ;;  %v342_v62 = vpop.f32.mrb[49].mxu0 }
 0x159   :  { %v3306_v2 = vmax.f32 %v529_v58, %v530_v59  ;;  %v343_v3 = vadd.f32 %v342_v62, %v3209_v40 }
 0x15a   :  { %v531_v4 = vmax.f32 %v341_v61, 0.0 }
 0x15b   :  { %v532_v5 = vmax.f32 %v343_v3, 0.0  ;;  %v346_v6 = vpop.f32.mrb[50].mxu0 }
 0x15c   :  { %v347_v10 = vadd.f32 %v346_v6, %v3206_v39  ;;  %v348_v12 = vpop.f32.mrb[51].mxu0 }
 0x15d   :  { %v603_v13 = vmax.f32 %v531_v4, %v532_v5  ;;  %v349_v14 = vadd.f32 %v348_v12, %v3209_v40 }
 0x15e   :  { %v533_v16 = vmax.f32 %v347_v10, 0.0 }
 0x15f   :  { %v3312_v18 = vmax.f32 %v3214_v50, %v603_v13  ;;  %v534_v19 = vmax.f32 %v349_v14, 0.0  ;;  %v352_v21 = vpop.f32.mrb[52].mxu0 }
 0x160   :  { %v353_v23 = vadd.f32 %v352_v21, %v3206_v39  ;;  %v354_v24 = vpop.f32.mrb[53].mxu0 }
 0x161   :  { %v604_v26 = vmax.f32 %v533_v16, %v534_v19  ;;  %v355_v27 = vadd.f32 %v354_v24, %v3209_v40 }
 0x162   :  { %v535_v28 = vmax.f32 %v353_v23, 0.0 }
 0x163   :  { %v3317_v31 = vmax.f32 %v3218_v57, %v604_v26  ;;  %v536_v32 = vmax.f32 %v355_v27, 0.0  ;;  %v358_v34 = vpop.f32.mrb[54].mxu0 }
 0x164   :  { %v359_v35 = vadd.f32 %v358_v34, %v3206_v39  ;;  %v360_v41 = vpop.f32.mrb[55].mxu0 }
 0x165   :  { %v605_v42 = vmax.f32 %v535_v28, %v536_v32  ;;  %v361_v50 = vadd.f32 %v360_v41, %v3209_v40 }
 0x166   :  { %v537_v44 = vmax.f32 %v359_v35, 0.0 }
 0x167   :  { %v3322_v46 = vmax.f32 %v3222_v0, %v605_v42  ;;  %v538_v48 = vmax.f32 %v361_v50, 0.0  ;;  %v364_v49 = vpop.f32.mrb[56].mxu0 }
 0x168   :  { %v365_v51 = vadd.f32 %v364_v49, %v3206_v39  ;;  %v366_v52 = vpop.f32.mrb[57].mxu0 }
 0x169   :  { %v606_v56 = vmax.f32 %v537_v44, %v538_v48  ;;  %v367_v57 = vadd.f32 %v366_v52, %v3209_v40 }
 0x16a   :  { %v539_v58 = vmax.f32 %v365_v51, 0.0 }
 0x16b   :  { %v3327_v59 = vmax.f32 %v3226_v8, %v606_v56  ;;  %v540_v60 = vmax.f32 %v367_v57, 0.0  ;;  %v370_v61 = vpop.f32.mrb[58].mxu0 }
 0x16c   :  { %v371_v62 = vadd.f32 %v370_v61, %v3206_v39  ;;  %v372_v3 = vpop.f32.mrb[59].mxu0 }
 0x16d   :  { %v607_v4 = vmax.f32 %v539_v58, %v540_v60  ;;  %v373_v0 = vadd.f32 %v372_v3, %v3209_v40 }
 0x16e   :  { %v541_v5 = vmax.f32 %v371_v62, 0.0 }
 0x16f   :  { %v3332_v6 = vmax.f32 %v3230_v15, %v607_v4  ;;  %v542_v10 = vmax.f32 %v373_v0, 0.0  ;;  %v376_v12 = vpop.f32.mrb[60].mxu0 }
 0x170   :  { %v377_v13 = vadd.f32 %v376_v12, %v3206_v39  ;;  %v378_v14 = vpop.f32.mrb[61].mxu0 }
 0x171   :  { %v608_v16 = vmax.f32 %v541_v5, %v542_v10  ;;  %v379_v8 = vadd.f32 %v378_v14, %v3209_v40 }
 0x172   :  { %v543_v19 = vmax.f32 %v377_v13, 0.0 }
 0x173   :  { %v3337_v21 = vmax.f32 %v3234_v22, %v608_v16  ;;  %v544_v23 = vmax.f32 %v379_v8, 0.0  ;;  %v382_v24 = vpop.f32.mrb[62].mxu0 }
 0x174   :  { %v383_v26 = vadd.f32 %v382_v24, %v3206_v39  ;;  %v384_v27 = vpop.f32.mrb[63].mxu0 }
 0x175   :  { %v609_v28 = vmax.f32 %v543_v19, %v544_v23  ;;  %v385_v15 = vadd.f32 %v384_v27, %v3209_v40 }
 0x176   :  { %v545_v32 = vmax.f32 %v383_v26, 0.0 }
 0x177   :  { %v3342_v34 = vmax.f32 %v3238_v29, %v609_v28  ;;  %v546_v35 = vmax.f32 %v385_v15, 0.0  ;;  %v388_v41 = vpop.f32.mrb[64].mxu0 }
 0x178   :  { %v389_v42 = vadd.f32 %v388_v41, %v3206_v39  ;;  %v390_v50 = vpop.f32.mrb[65].mxu0 }
 0x179   :  { %v610_v44 = vmax.f32 %v545_v32, %v546_v35  ;;  %v391_v22 = vadd.f32 %v390_v50, %v3209_v40 }
 0x17a   :  { %v547_v48 = vmax.f32 %v389_v42, 0.0 }
 0x17b   :  { %v3347_v49 = vmax.f32 %v3242_v37, %v610_v44  ;;  %v548_v51 = vmax.f32 %v391_v22, 0.0  ;;  %v394_v52 = vpop.f32.mrb[66].mxu0 }
 0x17c   :  { %v395_v56 = vadd.f32 %v394_v52, %v3206_v39  ;;  %v396_v57 = vpop.f32.mrb[67].mxu0 }
 0x17d   :  { %v611_v58 = vmax.f32 %v547_v48, %v548_v51  ;;  %v397_v29 = vadd.f32 %v396_v57, %v3209_v40  ;;  %v703_v51 = vmul.f32 %v3317_v31, %v3317_v31 }
 0x17e   :  { %v549_v60 = vmax.f32 %v395_v56, 0.0 }
 0x17f   :  { %v3352_v61 = vmax.f32 %v3246_v47, %v611_v58  ;;  %v550_v62 = vmax.f32 %v397_v29, 0.0  ;;  %v400_v3 = vpop.f32.mrb[68].mxu0  ;;  %v704_v29 = vmul.f32 %v3322_v46, %v3322_v46 }
 0x180   :  { %v401_v4 = vadd.f32 %v400_v3, %v3206_v39  ;;  %v402_v0 = vpop.f32.mrb[69].mxu0  ;;  %v651_v3 = vadd.f32 %v3317_v31, %v3312_v18 }
 0x181   :  { %v612_v5 = vmax.f32 %v549_v60, %v550_v62  ;;  %v403_v37 = vadd.f32 %v402_v0, %v3209_v40 }
 0x182   :  { %v551_v10 = vmax.f32 %v401_v4, 0.0 }
 0x183   :  { %v3357_v12 = vmax.f32 %v3250_v55, %v612_v5  ;;  %v552_v13 = vmax.f32 %v403_v37, 0.0  ;;  %v406_v14 = vpop.f32.mrb[70].mxu0 }
 0x184   :  { %v407_v16 = vadd.f32 %v406_v14, %v3206_v39  ;;  %v408_v8 = vpop.f32.mrb[71].mxu0 }
 0x185   :  { %v613_v19 = vmax.f32 %v551_v10, %v552_v13  ;;  %v409_v47 = vadd.f32 %v408_v8, %v3209_v40  ;;  %v652_v10 = vadd.f32 %v651_v3, %v3322_v46 }
 0x186   :  { %v553_v23 = vmax.f32 %v407_v16, 0.0 }
 0x187   :  { %v3362_v24 = vmax.f32 %v3254_v63, %v613_v19  ;;  %v554_v26 = vmax.f32 %v409_v47, 0.0  ;;  %v412_v27 = vpop.f32.mrb[72].mxu0  ;;  %v706_v19 = vmul.f32 %v3332_v6, %v3332_v6 }
 0x188   :  { %v413_v28 = vadd.f32 %v412_v27, %v3206_v39  ;;  %v414_v15 = vpop.f32.mrb[73].mxu0 }
 0x189   :  { %v614_v32 = vmax.f32 %v553_v23, %v554_v26  ;;  %v415_v55 = vadd.f32 %v414_v15, %v3209_v40  ;;  %v653_v26 = vadd.f32 %v652_v10, %v3327_v59 }
 0x18a   :  { %v555_v35 = vmax.f32 %v413_v28, 0.0 }
 0x18b   :  { %v3367_v41 = vmax.f32 %v3258_v9, %v614_v32  ;;  %v556_v42 = vmax.f32 %v415_v55, 0.0  ;;  %v418_v50 = vpop.f32.mrb[74].mxu0  ;;  %v702_v9 = vmul.f32 %v3312_v18, %v3312_v18  ;;  %v707_v32 = vmul.f32 %v3337_v21, %v3337_v21 }
 0x18c   :  { %v419_v44 = vadd.f32 %v418_v50, %v3206_v39  ;;  %v420_v22 = vpop.f32.mrb[75].mxu0  ;;  %v654_v55 = vadd.f32 %v653_v26, %v3332_v6 }
 0x18d   :  { %v615_v48 = vmax.f32 %v555_v35, %v556_v42  ;;  %v421_v63 = vadd.f32 %v420_v22, %v3209_v40  ;;  %v726_v5 = vadd.f32 %v703_v51, %v702_v9  ;;  %v708_v22 = vmul.f32 %v3342_v34, %v3342_v34 }
 0x18e   :  { %v557_v52 = vmax.f32 %v419_v44, 0.0  ;;  %v655_v51 = vadd.f32 %v654_v55, %v3337_v21  ;;  %v709_v9 = vmul.f32 %v3347_v49, %v3347_v49 }
 0x18f   :  { %v3374_v56 = vmax.f32 %v3262_v17, %v615_v48  ;;  %v558_v57 = vmax.f32 %v421_v63, 0.0  ;;  %v424_v58 = vpop.f32.mrb[76].mxu0  ;;  %v705_v17 = vmul.f32 %v3327_v59, %v3327_v59  ;;  %v727_v8 = vadd.f32 %v726_v5, %v704_v29 }
 0x190   :  { %v425_v60 = vadd.f32 %v424_v58, %v3206_v39  ;;  %v426_v62 = vpop.f32.mrb[77].mxu0  ;;  %v656_v29 = vadd.f32 %v655_v51, %v3342_v34 }
 0x191   :  { %v616_v4 = vmax.f32 %v557_v52, %v558_v57  ;;  %v427_v0 = vadd.f32 %v426_v62, %v3209_v40  ;;  %v728_v15 = vadd.f32 %v727_v8, %v705_v17  ;;  %v711_v8 = vmul.f32 %v3357_v12, %v3357_v12 }
 0x192   :  { %v559_v37 = vmax.f32 %v425_v60, 0.0 }
 0x193   :  { %v3388_v13 = vmax.f32 %v3266_v25, %v616_v4  ;;  %v560_v14 = vmax.f32 %v427_v0, 0.0  ;;  %v430_v16 = vpop.f32.mrb[78].mxu0  ;;  %v729_v44 = vadd.f32 %v728_v15, %v706_v19  ;;  %v710_v0 = vmul.f32 %v3352_v61, %v3352_v61 }
 0x194   :  { %v431_v47 = vadd.f32 %v430_v16, %v3206_v39  ;;  %v432_v23 = vpop.f32.mrb[79].mxu0 }
 0x195   :  { %v617_v27 = vmax.f32 %v559_v37, %v560_v14  ;;  %v433_v28 = vadd.f32 %v432_v23, %v3209_v40  ;;  %v730_v58 = vadd.f32 %v729_v44, %v707_v32  ;;  %v657_v37 = vadd.f32 %v656_v29, %v3347_v49 }
 0x196   :  { %v561_v25 = vmax.f32 %v431_v47, 0.0  ;;  %v713_v44 = vmul.f32 %v3367_v41, %v3367_v41 }
 0x197   :  { %v3399_v35 = vmax.f32 %v3270_v33, %v617_v27  ;;  %v562_v42 = vmax.f32 %v433_v28, 0.0  ;;  %v436_v50 = vpop.f32.mrb[80].mxu0  ;;  %v731_v4 = vadd.f32 %v730_v58, %v708_v22  ;;  %v658_v19 = vadd.f32 %v657_v37, %v3352_v61 }
 0x198   :  { %v437_v48 = vadd.f32 %v436_v50, %v3206_v39  ;;  %v438_v63 = vpop.f32.mrb[81].mxu0  ;;  %v712_v28 = vmul.f32 %v3362_v24, %v3362_v24 }
 0x199   :  { %v618_v52 = vmax.f32 %v561_v25, %v562_v42  ;;  %v439_v57 = vadd.f32 %v438_v63, %v3209_v40  ;;  %v732_v16 = vadd.f32 %v731_v4, %v709_v9  ;;  %v659_v25 = vadd.f32 %v658_v19, %v3357_v12 }
 0x19a   :  { %v563_v33 = vmax.f32 %v437_v48, 0.0  ;;  %v715_v4 = vmul.f32 %v3388_v13, %v3388_v13 }
 0x19b   :  { %v3410_v60 = vmax.f32 %v3274_v45, %v618_v52  ;;  %v564_v62 = vmax.f32 %v439_v57, 0.0  ;;  %v442_v3 = vpop.f32.mrb[82].mxu0  ;;  %v733_v27 = vadd.f32 %v732_v16, %v710_v0  ;;  %v660_v22 = vadd.f32 %v659_v25, %v3362_v24 }
 0x19c   :  { %v443_v5 = vadd.f32 %v442_v3, %v3206_v39  ;;  %v444_v17 = vpop.f32.mrb[83].mxu0  ;;  %v714_v57 = vmul.f32 %v3374_v56, %v3374_v56 }
 0x19d   :  { %v619_v10 = vmax.f32 %v563_v33, %v564_v62  ;;  %v445_v14 = vadd.f32 %v444_v17, %v3209_v40  ;;  %v734_v50 = vadd.f32 %v733_v27, %v711_v8  ;;  %v661_v33 = vadd.f32 %v660_v22, %v3367_v41 }
 0x19e   :  { %v565_v45 = vmax.f32 %v443_v5, 0.0  ;;  %v717_v27 = vmul.f32 %v3410_v60, %v3410_v60 }
 0x19f   :  { %v3421_v47 = vmax.f32 %v3278_v54, %v619_v10  ;;  %v566_v23 = vmax.f32 %v445_v14, 0.0  ;;  %v448_v26 = vpop.f32.mrb[84].mxu0  ;;  %v735_v52 = vadd.f32 %v734_v50, %v712_v28  ;;  %v662_v0 = vadd.f32 %v661_v33, %v3374_v56 }
 0x1a0   :  { %v449_v15 = vadd.f32 %v448_v26, %v3206_v39  ;;  %v450_v32 = vpop.f32.mrb[85].mxu0  ;;  %v716_v14 = vmul.f32 %v3399_v35, %v3399_v35 }
 0x1a1   :  { %v620_v55 = vmax.f32 %v565_v45, %v566_v23  ;;  %v451_v42 = vadd.f32 %v450_v32, %v3209_v40  ;;  %v736_v3 = vadd.f32 %v735_v52, %v713_v44  ;;  %v663_v45 = vadd.f32 %v662_v0, %v3388_v13 }
 0x1a2   :  { %v567_v54 = vmax.f32 %v449_v15, 0.0 }
 0x1a3   :  { %v3432_v48 = vmax.f32 %v3282_v1, %v620_v55  ;;  %v568_v63 = vmax.f32 %v451_v42, 0.0  ;;  %v454_v51 = vpop.f32.mrb[86].mxu0  ;;  %v737_v10 = vadd.f32 %v736_v3, %v714_v57  ;;  %v664_v28 = vadd.f32 %v663_v45, %v3399_v35 }
 0x1a4   :  { %v455_v58 = vadd.f32 %v454_v51, %v3206_v39  ;;  %v456_v9 = vpop.f32.mrb[87].mxu0  ;;  %v718_v42 = vmul.f32 %v3421_v47, %v3421_v47 }
 0x1a5   :  { %v621_v29 = vmax.f32 %v567_v54, %v568_v63  ;;  %v457_v62 = vadd.f32 %v456_v9, %v3209_v40  ;;  %v738_v26 = vadd.f32 %v737_v10, %v715_v4  ;;  %v665_v54 = vadd.f32 %v664_v28, %v3410_v60 }
 0x1a6   :  { %v569_v1 = vmax.f32 %v455_v58, 0.0  ;;  %v719_v52 = vmul.f32 %v3432_v48, %v3432_v48 }
 0x1a7   :  { %v3443_v5 = vmax.f32 %v3286_v11, %v621_v29  ;;  %v570_v17 = vmax.f32 %v457_v62, 0.0  ;;  %v460_v37 = vpop.f32.mrb[88].mxu0  ;;  %v739_v55 = vadd.f32 %v738_v26, %v716_v14  ;;  %v666_v57 = vadd.f32 %v665_v54, %v3421_v47 }
 0x1a8   :  { %v461_v16 = vadd.f32 %v460_v37, %v3206_v39  ;;  %v462_v8 = vpop.f32.mrb[89].mxu0 }
 0x1a9   :  { %v622_v19 = vmax.f32 %v569_v1, %v570_v17  ;;  %v463_v23 = vadd.f32 %v462_v8, %v3209_v40  ;;  %v740_v51 = vadd.f32 %v739_v55, %v717_v27  ;;  %v720_v62 = vmul.f32 %v3443_v5, %v3443_v5 }
 0x1aa   :  { %v571_v11 = vmax.f32 %v461_v16, 0.0  ;;  %v667_v1 = vadd.f32 %v666_v57, %v3432_v48 }
 0x1ab   :  { %v3454_v15 = vmax.f32 %v3290_v20, %v622_v19  ;;  %v572_v32 = vmax.f32 %v463_v23, 0.0  ;;  %v466_v25 = vpop.f32.mrb[90].mxu0  ;;  %v741_v29 = vadd.f32 %v740_v51, %v718_v42 }
 0x1ac   :  { %v467_v50 = vadd.f32 %v466_v25, %v3206_v39  ;;  %v468_v44 = vpop.f32.mrb[91].mxu0  ;;  %v668_v14 = vadd.f32 %v667_v1, %v3443_v5 }
 0x1ad   :  { %v623_v22 = vmax.f32 %v571_v11, %v572_v32  ;;  %v469_v63 = vadd.f32 %v468_v44, %v3209_v40  ;;  %v742_v37 = vadd.f32 %v741_v29, %v719_v52  ;;  %v721_v10 = vmul.f32 %v3454_v15, %v3454_v15 }
 0x1ae   :  { %v573_v20 = vmax.f32 %v467_v50, 0.0  ;;  %v669_v27 = vadd.f32 %v668_v14, %v3454_v15  ;;  %v906_v14 = vld [vmem:[%s4336_s2 + $0x80] sm:$0xff] }
 0x1af   :  { %v3465_v58 = vmax.f32 %v3294_v30, %v623_v22  ;;  %v574_v9 = vmax.f32 %v469_v63, 0.0  ;;  %v472_v33 = vpop.f32.mrb[92].mxu0  ;;  %v743_v19 = vadd.f32 %v742_v37, %v720_v62 }
 0x1b0   :  { %v473_v3 = vadd.f32 %v472_v33, %v3206_v39  ;;  %v474_v4 = vpop.f32.mrb[93].mxu0 }
 0x1b1   :  { %v624_v0 = vmax.f32 %v573_v20, %v574_v9  ;;  %v475_v17 = vadd.f32 %v474_v4, %v3209_v40  ;;  %v722_v11 = vmul.f32 %v3465_v58, %v3465_v58  ;;  %v744_v25 = vadd.f32 %v743_v19, %v721_v10 }
 0x1b2   :  { %v575_v30 = vmax.f32 %v473_v3, 0.0  ;;  %v670_v42 = vadd.f32 %v669_v27, %v3465_v58  ;;  %v910_v27 = vld [vmem:[%s4336_s2 + $0xa0] sm:$0xff] }
 0x1b3   :  { %v3476_v16 = vmax.f32 %v3298_v43, %v624_v0  ;;  %v576_v8 = vmax.f32 %v475_v17, 0.0  ;;  %v478_v45 = vpop.f32.mrb[94].mxu0  ;;  %v745_v44 = vadd.f32 %v744_v25, %v722_v11  ;;  %v911_v11 = vld [vmem:[%s4336_s2 + $0xa8] sm:$0xff] }
 0x1b4   :  { %v479_v23 = vadd.f32 %v478_v45, %v3206_v39  ;;  %v480_v26 = vpop.f32.mrb[95].mxu0  ;;  %v908_v45 = vld [vmem:[%s4336_s2 + $0x90] sm:$0xff] }
 0x1b5   :  { %v625_v28 = vmax.f32 %v575_v30, %v576_v8  ;;  %v481_v32 = vadd.f32 %v480_v26, %v3209_v40  ;;  %v723_v43 = vmul.f32 %v3476_v16, %v3476_v16  ;;  %v671_v54 = vadd.f32 %v670_v42, %v3476_v16  ;;  %v907_v8 = vld [vmem:[%s4336_s2 + $0x88] sm:$0xff] }
 0x1b6   :  { %v577_v55 = vmax.f32 %v479_v23, 0.0  ;;  %v2502_v19 = vpack.c.bf16 %v907_v8, %v906_v14  ;;  %v909_v23 = vld [vmem:[%s4336_s2 + $0x98] sm:$0xff]  ;;  %v914_v14 = vld [vmem:[%s4336_s2 + $0xc0] sm:$0xff]  ;;  %v915_v8 = vld [vmem:[%s4336_s2 + $0xc8] sm:$0xff] }
 0x1b7   :  { %v3487_v50 = vmax.f32 %v3302_v53, %v625_v28  ;;  %v578_v39 = vmax.f32 %v481_v32, 0.0  ;;  %v746_v51 = vadd.f32 %v745_v44, %v723_v43  ;;  %v2506_v26 = vpack.c.bf16 %v909_v23, %v908_v45  ;;  %v916_v23 = vld [vmem:[%s4336_s2 + $0xd0] sm:$0xff] }
 0x1b8   :  { %2503 = vmatprep.subr.bf16.mxu1 %v2502_v19  ;;  %v2510_v28 = vpack.c.bf16 %v911_v11, %v910_v27  ;;  %v2518_v45 = vpack.c.bf16 %v915_v8, %v914_v14 }
 0x1b9   :  { %v724_v22 = vmul.f32 %v3487_v50, %v3487_v50  ;;  %v626_v63 = vmax.f32 %v577_v55, %v578_v39  ;;  %v672_v40 = vadd.f32 %v671_v54, %v3487_v50  ;;  %2505 = vmatpush3.bf16.msra.mxu1 %v2502_v19  ;;  %v34_v19 = vld [vmem:[%s4340_s6 + $0x4] ss:$0 sm:$0xff] }
 0x1ba   :  { %2507 = vmatprep.subr.bf16.mxu1 %v2506_v26 }
 0x1bb   :  { %v3494_v52 = vmax.f32 %v3306_v2, %v626_v63  ;;  %v747_v20 = vadd.f32 %v746_v51, %v724_v22 }
 0x1bd   :  { %v673_v57 = vadd.f32 %v672_v40, %v3494_v52  ;;  %v725_v53 = vmul.f32 %v3494_v52, %v3494_v52  ;;  %2509 = vmatpush3.bf16.msra.mxu1 %v2506_v26  ;;  %v917_v26 = vld [vmem:[%s4336_s2 + $0xd8] sm:$0xff] }
 0x1be   :  { %2511 = vmatprep.subr.bf16.mxu1 %v2510_v28  ;;  %v2522_v27 = vpack.c.bf16 %v917_v26, %v916_v23  ;;  %v892_v26 = vld [vmem:[%s4336_s2 + $0x10] sm:$0xff] }
 0x1bf   :  { %v674_v9 = vrot.slane %v673_v57, 4  ;;  %v748_v33 = vadd.f32 %v747_v20, %v725_v53 }
 0x1c1   :  { %v675_v29 = vadd.f32 %v674_v9, %v673_v57  ;;  %v749_v62 = vrot.slane %v748_v33, 4  ;;  %2513 = vmatpush3.bf16.msra.mxu1 %v2510_v28 }
 0x1c3   :  { %v676_v3 = vrot.slane %v675_v29, 2  ;;  %v750_v4 = vadd.f32 %v749_v62, %v748_v33 }
 0x1c5   :  { %v677_v1 = vadd.f32 %v676_v3, %v675_v29  ;;  %v751_v0 = vrot.slane %v750_v4, 2 }
 0x1c7   :  { %v678_v17 = vrot.slane %v677_v1, 1  ;;  %v752_v10 = vadd.f32 %v751_v0, %v750_v4 }
 0x1c9   :  { %v679_v37 = vadd.f32 %v678_v17, %v677_v1  ;;  %v753_v2 = vrot.slane %v752_v10, 1 }
 0x1cb   :  { %689 = vrot.lane.b32.xlu1 %v679_v37, %s2854_s0  ;;  %681 = vrot.lane.b32.xlu0 %v679_v37, %s2855_s21  ;;  %v754_v30 = vadd.f32 %v753_v2, %v752_v10  ;;  %v912_v10 = vld [vmem:[%s4336_s2 + $0xb0] sm:$0xff]  ;;  %v913_v2 = vld [vmem:[%s4336_s2 + $0xb8] sm:$0xff] }
 0x1cf   :  { %693 = vrot.lane.b32.xlu1 %v679_v37, %s2856_s22  ;;  %685 = vrot.lane.b32.xlu0 %v679_v37, %s2857_s23 }
 0x1d3   :  { %756 = vrot.lane.b32.xlu1 %v754_v30, %s2855_s21  ;;  %760 = vrot.lane.b32.xlu0 %v754_v30, %s2857_s23  ;;  %s2863_s21 = smov 40  }
 0x1d7   :  { %697 = vrot.lane.b32.xlu1 %v679_v37, %s2858_s1  ;;  %764 = vrot.lane.b32.xlu0 %v754_v30, %s2854_s0  ;;  %s2862_s0 = smov 32  }
 0x1db   :  { %772 = vrot.lane.b32.xlu1 %v754_v30, %s2858_s1  ;;  %768 = vrot.lane.b32.xlu0 %v754_v30, %s2856_s22  ;;  %s2865_s1 = smov 80  }
 0x23d   :  { %v690_v32 = vpop.permute.xlu1 %689  ;;  %v682_v25 = vpop.permute.xlu0 %681 }
 0x23e   :  { %v684_v55 = vadd.f32 %v682_v25, %v679_v37  ;;  %v918_v25 = vld [vmem:[%s4336_s2 + $0xe0] sm:$0xff] }
 0x241   :  { %v694_v42 = vpop.permute.xlu1 %693  ;;  %v686_v43 = vpop.permute.xlu0 %685 }
 0x242   :  { %v688_v39 = vadd.f32 %v686_v43, %v684_v55  ;;  %v919_v55 = vld [vmem:[%s4336_s2 + $0xe8] sm:$0xff] }
 0x243   :  { %v2526_v43 = vpack.c.bf16 %v919_v55, %v918_v25 }
 0x244   :  { %v692_v44 = vadd.f32 %v690_v32, %v688_v39  ;;  %v35_v32 = vld [vmem:[%s4340_s6 + $0x5] ss:$0 sm:$0xff] }
 0x245   :  { %v757_v54 = vpop.permute.xlu1 %756  ;;  %v761_v22 = vpop.permute.xlu0 %760 }
 0x246   :  { %v759_v63 = vadd.f32 %v757_v54, %v754_v30  ;;  %v696_v40 = vadd.f32 %v694_v42, %v692_v44  ;;  %v2514_v30 = vpack.c.bf16 %v913_v2, %v912_v10  ;;  %v920_v44 = vld [vmem:[%s4336_s2 + $0xf0] sm:$0xff]  ;;  %v921_v54 = vld [vmem:[%s4336_s2 + $0xf8] sm:$0xff] }
 0x248   :  { %v763_v51 = vadd.f32 %v761_v22, %v759_v63  ;;  %2515 = vmatprep.subr.bf16.mxu1 %v2514_v30  ;;  %v2530_v22 = vpack.c.bf16 %v921_v54, %v920_v44  ;;  %v890_v63 = vld [vmem:[%s4336_s2] sm:$0xff] }
 0x249   :  { %v698_v20 = vpop.permute.xlu1 %697  ;;  %v765_v57 = vpop.permute.xlu0 %764  ;;  %2517 = vmatpush3.bf16.msra.mxu1 %v2514_v30 }
 0x24a   :  { %v700_v53 = vadd.f32 %v698_v20, %v696_v40  ;;  %v767_v9 = vadd.f32 %v765_v57, %v763_v51  ;;  %2519 = vmatprep.subr.bf16.mxu1 %v2518_v45  ;;  %v891_v51 = vld [vmem:[%s4336_s2 + $0x8] sm:$0xff] }
 0x24b   :  { %v3566_v40 = vpack.c.bf16 %v891_v51, %v890_v63 }
 0x24c   :  { %v701_v29 = vmul.f32 0.00086805556, %v700_v53 }
 0x24d   :  { %v769_v33 = vpop.permute.xlu0 %768  ;;  %v773_v3 = vpop.permute.xlu1 %772  ;;  %2521 = vmatpush3.bf16.msra.mxu1 %v2518_v45 }
 0x24e   :  { %v771_v62 = vadd.f32 %v769_v33, %v767_v9  ;;  %v777_v1 = vmul.f32 %v701_v29, %v701_v29  ;;  %2523 = vmatprep.subr.bf16.mxu1 %v2522_v27 }
 0x250   :  { %v775_v4 = vadd.f32 %v773_v3, %v771_v62 }
 0x251   :  { %2525 = vmatpush3.bf16.msra.mxu1 %v2522_v27 }
 0x252   :  { %v776_v0 = vmul.f32 0.00086805556, %v775_v4  ;;  %2527 = vmatprep.subr.bf16.mxu1 %v2526_v43 }
 0x254   :  { %v778_v17 = vsub.f32 %v776_v0, %v777_v1 }
 0x255   :  { %2529 = vmatpush3.bf16.msra.mxu1 %v2526_v43 }
 0x256   :  { %v779_v37 = vadd.f32 1e-05, %v778_v17  ;;  %2531 = vmatprep.subr.bf16.mxu1 %v2530_v22 }
 0x258   :  { %2819 = vrsqrt.f32 %v779_v37 }
 0x259   :  { %2533 = vmatpush3.bf16.msra.mxu1 %v2530_v22 }
 0x25a   :  { %2535 = vmatprep.subr.bf16.mxu1 %v3566_v40 }
 0x262   :  { %v2820_v11 = vpop.eup %2819 }
 0x263   :  { %v781_v28 = vmul.f32 %v2820_v11, %v34_v19  ;;  %v893_v11 = vld [vmem:[%s4336_s2 + $0x18] sm:$0xff] }
 0x265   :  { %788 = vrot.lane.b32.xlu1 %v781_v28, %s2859_s10  ;;  %785 = vrot.lane.b32.xlu0 %v781_v28, %s2860_s11  ;;  %v782_v42 = vmul.f32 %v781_v28, %v701_v29 }
 0x267   :  { %v783_v39 = vsub.f32 %v35_v32, %v782_v42  ;;  %v895_v32 = vld [vmem:[%s4336_s2 + $0x28] sm:$0xff] }
 0x269   :  { %791 = vrot.lane.b32.xlu0 %v781_v28, %s2861_s16  ;;  %813 = vrot.lane.b32.xlu1 %v783_v39, %s2860_s11 }
 0x26d   :  { %794 = vrot.lane.b32.xlu0 %v781_v28, %s2862_s0  ;;  %816 = vrot.lane.b32.xlu1 %v783_v39, %s2859_s10 }
 0x271   :  { %797 = vrot.lane.b32.xlu0 %v781_v28, %s2863_s21  ;;  %819 = vrot.lane.b32.xlu1 %v783_v39, %s2861_s16 }
 0x275   :  { %822 = vrot.lane.b32.xlu0 %v783_v39, %s2862_s0  ;;  %825 = vrot.lane.b32.xlu1 %v783_v39, %s2863_s21  ;;  %s2864_s21 = smov 64  }
 0x2d7   :  { %v789_v20 = vpop.permute.xlu1 %788  ;;  %v786_v57 = vpop.permute.xlu0 %785 }
 0x2d8   :  { %v801_v33 = vsel %vm800_vm0, %v781_v28, %v786_v57  ;;  %v894_v28 = vld [vmem:[%s4336_s2 + $0x20] sm:$0xff] }
 0x2d9   :  { %v803_v3 = vsel %vm802_vm1, %v801_v33, %v789_v20  ;;  %v2542_v44 = vpack.c.bf16 %v895_v32, %v894_v28  ;;  %v902_v28 = vld [vmem:[%s4336_s2 + $0x60] sm:$0xff]  ;;  %v903_v32 = vld [vmem:[%s4336_s2 + $0x68] sm:$0xff] }
 0x2db   :  { %v792_v53 = vpop.permute.xlu0 %791  ;;  %v814_v9 = vpop.permute.xlu1 %813 }
 0x2dc   :  { %v805_v4 = vsel %vm804_vm2, %v803_v3, %v792_v53  ;;  %v828_v10 = vsel %vm800_vm0, %v783_v39, %v814_v9  ;;  %v2538_v39 = vpack.c.bf16 %v893_v11, %v892_v26  ;;  %v900_v11 = vld [vmem:[%s4336_s2 + $0x50] sm:$0xff] }
 0x2df   :  { %v795_v29 = vpop.permute.xlu0 %794  ;;  %v817_v62 = vpop.permute.xlu1 %816 }
 0x2e0   :  { %v807_v1 = vsel %vm806_vm3, %v805_v4, %v795_v29  ;;  %v829_v30 = vsel %vm802_vm1, %v828_v10, %v817_v62 }
 0x2e3   :  { %v798_v0 = vpop.permute.xlu0 %797  ;;  %v820_v17 = vpop.permute.xlu1 %819 }
 0x2e4   :  { %v809_v37 = vsel %vm808_vm4, %v807_v1, %v798_v0  ;;  %v830_v8 = vsel %vm804_vm2, %v829_v30, %v820_v17 }
 0x2e5   :  { %v811_v2 = vsel %vm810_vm5, %v809_v37, 0.0 }
 0x2e6   :  { %v3579_v14 = vrot.slane %v811_v2, %v3198_v36 }
 0x2e7   :  { %v823_v45 = vpop.permute.xlu0 %822  ;;  %v826_v19 = vpop.permute.xlu1 %825 }
 0x2e8   :  { %v831_v23 = vsel %vm806_vm3, %v830_v8, %v823_v45  ;;  %v842_v42 = vmul.f32 %v3579_v14, %v3332_v6  ;;  %v843_v43 = vmul.f32 %v3579_v14, %v3337_v21  ;;  %v844_v63 = vmul.f32 %v3579_v14, %v3342_v34 }
 0x2e9   :  { %v832_v27 = vsel %vm808_vm4, %v831_v23, %v826_v19  ;;  %v845_v51 = vmul.f32 %v3579_v14, %v3347_v49  ;;  %v850_v6 = vmul.f32 %v3579_v14, %v3374_v56  ;;  %v851_v21 = vmul.f32 %v3579_v14, %v3388_v13 }
 0x2ea   :  { %v833_v25 = vsel %vm810_vm5, %v832_v27, 0.0  ;;  %v852_v20 = vmul.f32 %v3579_v14, %v3399_v35  ;;  %v853_v57 = vmul.f32 %v3579_v14, %v3410_v60  ;;  %v846_v49 = vmul.f32 %v3579_v14, %v3352_v61 }
 0x2eb   :  { %v3598_v55 = vrot.slane %v833_v25, %v3198_v36  ;;  %v847_v56 = vmul.f32 %v3579_v14, %v3357_v12  ;;  %v854_v61 = vmul.f32 %v3579_v14, %v3421_v47  ;;  %v855_v12 = vmul.f32 %v3579_v14, %v3432_v48  ;;  %v896_v47 = vld [vmem:[%s4336_s2 + $0x30] sm:$0xff]  ;;  %v897_v48 = vld [vmem:[%s4336_s2 + $0x38] sm:$0xff] }
 0x2ec   :  { %v856_v33 = vmul.f32 %v3579_v14, %v3443_v5  ;;  %v857_v62 = vmul.f32 %v3579_v14, %v3454_v15  ;;  %v859_v3 = vmul.f32 %v3579_v14, %v3476_v16  ;;  %v861_v17 = vmul.f32 %v3579_v14, %v3494_v52  ;;  %v898_v52 = vld [vmem:[%s4336_s2 + $0x40] sm:$0xff] }
 0x2ed   :  { %v3605_v54 = vadd.f32 %v3598_v55, %v842_v42  ;;  %v3608_v22 = vadd.f32 %v3598_v55, %v843_v43  ;;  %v3624_v53 = vadd.f32 %v3598_v55, %v844_v63  ;;  %v3627_v34 = vadd.f32 %v3598_v55, %v845_v51  ;;  %v904_v42 = vld [vmem:[%s4336_s2 + $0x70] sm:$0xff]  ;;  %v905_v43 = vld [vmem:[%s4336_s2 + $0x78] sm:$0xff]  ;;  %v1133_v63 = vld [vmem:[%s4336_s2 + $0x108] sm:$0xff] }
 0x2ee   :  { %v3635_v13 = vadd.f32 %v3598_v55, %v850_v6  ;;  %v3638_v35 = vadd.f32 %v3598_v55, %v851_v21  ;;  %v3641_v60 = vadd.f32 %v3598_v55, %v852_v20  ;;  %v3644_v9 = vadd.f32 %v3598_v55, %v853_v57  ;;  %v1134_v6 = vld [vmem:[%s4336_s2 + $0x110] sm:$0xff]  ;;  %v1135_v21 = vld [vmem:[%s4336_s2 + $0x118] sm:$0xff] }
 0x2ef   :  { %2263 = vmatprep.mubr.f32.mxu1 %v3605_v54  ;;  %v3655_v29 = vadd.f32 %v3598_v55, %v846_v49  ;;  %v3670_v5 = vadd.f32 %v3598_v55, %v854_v61  ;;  %v3673_v4 = vadd.f32 %v3598_v55, %v855_v12  ;;  %v3676_v15 = vadd.f32 %v3598_v55, %v856_v33  ;;  %v1136_v12 = vld [vmem:[%s4336_s2 + $0x120] sm:$0xff]  ;;  %v1137_v33 = vld [vmem:[%s4336_s2 + $0x128] sm:$0xff] }
 0x2f0   :  { %2264 = vmatmul.mubr.f32.vlgmr.msra.gmra.mrb[0].mxu1 %v3608_v22  ;;  %v3682_v16 = vadd.f32 %v3598_v55, %v857_v62  ;;  %v3688_v0 = vadd.f32 %v3598_v55, %v859_v3  ;;  %v3699_v10 = vadd.f32 %v3598_v55, %v847_v56  ;;  %v2546_v2 = vpack.c.bf16 %v897_v48, %v896_v47  ;;  %v1139_v3 = vld [vmem:[%s4336_s2 + $0x138] sm:$0xff] }
 0x2f1   :  { %2537 = vmatpush3.bf16.msra.mxu1 %v3566_v40  ;;  %2266 = vmatprep.mubr.f32.mxu1 %v3624_v53  ;;  %v858_v40 = vmul.f32 %v3579_v14, %v3465_v58  ;;  %v860_v58 = vmul.f32 %v3579_v14, %v3487_v50  ;;  %v848_v50 = vmul.f32 %v3579_v14, %v3362_v24  ;;  %v899_v24 = vld [vmem:[%s4336_s2 + $0x48] sm:$0xff]  ;;  %v1143_v48 = vld [vmem:[%s4336_s2 + $0x158] sm:$0xff] }
 0x2f2   :  { %2539 = vmatprep.subr.bf16.mxu1 %v2538_v39  ;;  %v3702_v30 = vadd.f32 %v3598_v55, %v861_v17  ;;  %v849_v45 = vmul.f32 %v3579_v14, %v3367_v41  ;;  %v838_v19 = vmul.f32 %v3579_v14, %v3312_v18  ;;  %v2550_v26 = vpack.c.bf16 %v899_v24, %v898_v52  ;;  %v901_v41 = vld [vmem:[%s4336_s2 + $0x58] sm:$0xff]  ;;  %v1262_v52 = vld [vmem:[%s4336_s2 + $0x188] sm:$0xff] }
 0x2f3   :  { %v3685_v1 = vadd.f32 %v3598_v55, %v858_v40  ;;  %v3696_v37 = vadd.f32 %v3598_v55, %v860_v58  ;;  %v3705_v8 = vadd.f32 %v3598_v55, %v848_v50  ;;  %v2554_v18 = vpack.c.bf16 %v901_v41, %v900_v11  ;;  %v1138_v40 = vld [vmem:[%s4336_s2 + $0x130] sm:$0xff]  ;;  %v1145_v58 = vld [vmem:[%s4336_s2 + $0x168] sm:$0xff] }
 0x2f4   :  { %2267 = vmatmul.mubr.f32.gmra.mrb[2].mxu1 %v3627_v34  ;;  %v3720_v23 = vadd.f32 %v3598_v55, %v849_v45  ;;  %v866_v27 = vadd.f32 %v3598_v55, %v838_v19  ;;  %v2558_v25 = vpack.c.bf16 %v903_v32, %v902_v28  ;;  %v839_v20 = vmul.f32 %v3579_v14, %v3317_v31  ;;  %v1263_v45 = vld [vmem:[%s4336_s2 + $0x190] sm:$0xff]  ;;  %v1264_v19 = vld [vmem:[%s4336_s2 + $0x198] sm:$0xff]  ;;  %v1266_v11 = vld [vmem:[%s4336_s2 + $0x1a8] sm:$0xff] }
 0x2f5   :  { %2541 = vmatpush3.bf16.msra.mxu1 %v2538_v39  ;;  %2269 = vmatprep.mubr.f32.mxu1 %v3655_v29  ;;  %v2562_v39 = vpack.c.bf16 %v905_v43, %v904_v42  ;;  %v840_v57 = vmul.f32 %v3579_v14, %v3322_v46  ;;  %v2570_v56 = vpack.c.bf16 %v1135_v21, %v1134_v6  ;;  %v1268_v28 = vld [vmem:[%s4336_s2 + $0x1b8] sm:$0xff]  ;;  %v1270_v32 = vld [vmem:[%s4336_s2 + $0x1c8] sm:$0xff]  ;;  %v1390_v21 = vld [vmem:[%s4336_s2 + $0x200] sm:$0xff] }
 0x2f6   :  { %2543 = vmatprep.subr.bf16.mxu1 %v2542_v44  ;;  %v867_v49 = vadd.f32 %v3598_v55, %v839_v20  ;;  %v841_v31 = vmul.f32 %v3579_v14, %v3327_v59  ;;  %v2574_v62 = vpack.c.bf16 %v1137_v33, %v1136_v12  ;;  %v2578_v59 = vpack.c.bf16 %v1139_v3, %v1138_v40  ;;  %v1140_v14 = vld [vmem:[%s4336_s2 + $0x140] sm:$0xff]  ;;  %v1272_v42 = vld [vmem:[%s4336_s2 + $0x1d8] sm:$0xff]  ;;  %v1391_v20 = vld [vmem:[%s4336_s2 + $0x208] sm:$0xff] }
 0x2f7   :  { %v868_v61 = vadd.f32 %v3598_v55, %v840_v57  ;;  %v2630_v57 = vpack.c.bf16 %v1391_v20, %v1390_v21  ;;  %v1394_v12 = vld [vmem:[%s4336_s2 + $0x220] sm:$0xff]  ;;  %v1395_v33 = vld [vmem:[%s4336_s2 + $0x228] sm:$0xff]  ;;  %v1400_v3 = vld [vmem:[%s4336_s2 + $0x250] sm:$0xff] }
 0x2f8   :  { %2270 = vmatmul.mubr.f32.gmra.mrb[4].mxu1 %v3699_v10  ;;  %v869_v46 = vadd.f32 %v3598_v55, %v841_v31  ;;  %v1141_v55 = vld [vmem:[%s4336_s2 + $0x148] sm:$0xff]  ;;  %v2638_v31 = vpack.c.bf16 %v1395_v33, %v1394_v12  ;;  %v1708_v21 = vld [vmem:[%s4337_s3 + $0x20] sm:$0xff] }
 0x2f9   :  { %2545 = vmatpush3.bf16.msra.mxu1 %v2542_v44  ;;  %2272 = vmatprep.mubr.f32.mxu1 %v3705_v8  ;;  %v1132_v44 = vld [vmem:[%s4336_s2 + $0x100] sm:$0xff]  ;;  %v2582_v47 = vpack.c.bf16 %v1141_v55, %v1140_v14  ;;  %v1399_v40 = vld [vmem:[%s4336_s2 + $0x248] sm:$0xff] }
 0x2fa   :  { %2547 = vmatprep.subr.bf16.mxu1 %v2546_v2  ;;  %v2566_v51 = vpack.c.bf16 %v1133_v63, %v1132_v44  ;;  %v1274_v44 = vld [vmem:[%s4336_s2 + $0x1e8] sm:$0xff]  ;;  %v1402_v55 = vld [vmem:[%s4336_s2 + $0x260] sm:$0xff] }
 0x2fb   :  { %v1712_v12 = vld [vmem:[%s4337_s3 + $0x40] sm:$0xff] }
 0x2fc   :  { %2273 = vmatmul.mubr.f32.gmra.mrb[6].mxu1 %v3720_v23 }
 0x2fd   :  { %2549 = vmatpush3.bf16.msra.mxu1 %v2546_v2  ;;  %2307 = vmatprep.mubr.f32.mxu1 %v866_v27  ;;  %v1261_v2 = vld [vmem:[%s4336_s2 + $0x180] sm:$0xff] }
 0x2fe   :  { %2551 = vmatprep.subr.bf16.mxu1 %v2550_v26  ;;  %v2598_v24 = vpack.c.bf16 %v1262_v52, %v1261_v2  ;;  %v1265_v27 = vld [vmem:[%s4336_s2 + $0x1a0] sm:$0xff] }
 0x2ff   :  { %v2606_v41 = vpack.c.bf16 %v1266_v11, %v1265_v27 }
 0x301   :  { %2553 = vmatpush3.bf16.msra.mxu1 %v2550_v26  ;;  %v2602_v26 = vpack.c.bf16 %v1264_v19, %v1263_v45 }
 0x302   :  { %2555 = vmatprep.subr.bf16.mxu1 %v2554_v18 }
 0x305   :  { %2557 = vmatpush3.bf16.msra.mxu1 %v2554_v18  ;;  %v1267_v18 = vld [vmem:[%s4336_s2 + $0x1b0] sm:$0xff] }
 0x306   :  { %2559 = vmatprep.subr.bf16.mxu1 %v2558_v25 }
 0x309   :  { %2561 = vmatpush3.bf16.msra.mxu1 %v2558_v25  ;;  %v1271_v25 = vld [vmem:[%s4336_s2 + $0x1d0] sm:$0xff] }
 0x30a   :  { %2563 = vmatprep.subr.bf16.mxu1 %v2562_v39  ;;  %v2618_v43 = vpack.c.bf16 %v1272_v42, %v1271_v25 }
 0x30d   :  { %2565 = vmatpush3.bf16.msra.mxu1 %v2562_v39  ;;  %v1273_v39 = vld [vmem:[%s4336_s2 + $0x1e0] sm:$0xff] }
 0x30e   :  { %2567 = vmatprep.subr.bf16.mxu1 %v2566_v51  ;;  %v2622_v63 = vpack.c.bf16 %v1274_v44, %v1273_v39 }
 0x310   :  { %2308 = vmatmul.mubr.f32.vlgmr.msra.gmra.mrb[0].mxu1 %v867_v49  ;;  %v1392_v49 = vld [vmem:[%s4336_s2 + $0x210] sm:$0xff] }
 0x311   :  { %2310 = vmatprep.mubr.f32.mxu1 %v868_v61  ;;  %2569 = vmatpush3.bf16.msra.mxu1 %v2566_v51  ;;  %v1275_v51 = vld [vmem:[%s4336_s2 + $0x1f0] sm:$0xff] }
 0x312   :  { %2571 = vmatprep.subr.bf16.mxu1 %v2570_v56 }
 0x314   :  { %2311 = vmatmul.mubr.f32.gmra.mrb[2].mxu1 %v869_v46  ;;  %v1396_v46 = vld [vmem:[%s4336_s2 + $0x230] sm:$0xff] }
 0x315   :  { %2313 = vmatprep.mubr.f32.mxu1 %v3605_v54  ;;  %2573 = vmatpush3.bf16.msra.mxu1 %v2570_v56  ;;  %v1142_v54 = vld [vmem:[%s4336_s2 + $0x150] sm:$0xff]  ;;  %v1393_v56 = vld [vmem:[%s4336_s2 + $0x218] sm:$0xff] }
 0x316   :  { %2575 = vmatprep.subr.bf16.mxu1 %v2574_v62  ;;  %v2634_v61 = vpack.c.bf16 %v1393_v56, %v1392_v49  ;;  %v1713_v56 = vld [vmem:[%s4337_s3 + $0x48] sm:$0xff] }
 0x318   :  { %2314 = vmatmul.mubr.f32.gmra.mrb[4].mxu1 %v3608_v22  ;;  %v2586_v22 = vpack.c.bf16 %v1143_v48, %v1142_v54  ;;  %v1404_v48 = vld [vmem:[%s4336_s2 + $0x270] sm:$0xff] }
 0x319   :  { %2316 = vmatprep.mubr.f32.mxu1 %v3624_v53  ;;  %2577 = vmatpush3.bf16.msra.mxu1 %v2574_v62  ;;  %v1144_v53 = vld [vmem:[%s4336_s2 + $0x160] sm:$0xff]  ;;  %v1397_v62 = vld [vmem:[%s4336_s2 + $0x238] sm:$0xff] }
 0x31a   :  { %2579 = vmatprep.subr.bf16.mxu1 %v2578_v59  ;;  %v2590_v17 = vpack.c.bf16 %v1145_v58, %v1144_v53 }
 0x31c   :  { %2317 = vmatmul.mubr.f32.gmra.mrb[6].mxu1 %v3627_v34  ;;  %v1146_v34 = vld [vmem:[%s4336_s2 + $0x170] sm:$0xff] }
 0x31d   :  { %2581 = vmatpush3.bf16.msra.mxu1 %v2578_v59  ;;  %2351 = vmatprep.mubr.f32.mxu1 %v3655_v29  ;;  %v1147_v29 = vld [vmem:[%s4336_s2 + $0x178] sm:$0xff] }
 0x31e   :  { %2583 = vmatprep.subr.bf16.mxu1 %v2582_v47  ;;  %v2594_v50 = vpack.c.bf16 %v1147_v29, %v1146_v34  ;;  %v1401_v59 = vld [vmem:[%s4336_s2 + $0x258] sm:$0xff] }
 0x31f   :  { %v2650_v14 = vpack.c.bf16 %v1401_v59, %v1400_v3  ;;  %v1721_v3 = vld [vmem:[%s4337_s3 + $0x88] sm:$0xff]  ;;  %v1723_v59 = vld [vmem:[%s4337_s3 + $0x98] sm:$0xff] }
 0x321   :  { %2585 = vmatpush3.bf16.msra.mxu1 %v2582_v47  ;;  %v1403_v47 = vld [vmem:[%s4336_s2 + $0x268] sm:$0xff] }
 0x322   :  { %2587 = vmatprep.subr.bf16.mxu1 %v2586_v22  ;;  %v2654_v54 = vpack.c.bf16 %v1403_v47, %v1402_v55  ;;  %v2678_v55 = vpack.c.bf16 %v1723_v59, %v1721_v3  ;;  %v1720_v47 = vld [vmem:[%s4337_s3 + $0x80] sm:$0xff] }
 0x325   :  { %2589 = vmatpush3.bf16.msra.mxu1 %v2586_v22 }
 0x326   :  { %2591 = vmatprep.subr.bf16.mxu1 %v2590_v17 }
 0x329   :  { %2593 = vmatpush3.bf16.msra.mxu1 %v2590_v17  ;;  %v36_v17 = vld [vmem:[%s4340_s6 + $0x6] ss:$0 sm:$0xff] }
 0x32a   :  { %2595 = vmatprep.subr.bf16.mxu1 %v2594_v50 }
 0x32d   :  { %2597 = vmatpush3.bf16.msra.mxu1 %v2594_v50 }
 0x32e   :  { %2599 = vmatprep.subr.bf16.mxu1 %v2598_v24 }
 0x330   :  { %2352 = vmatmul.mubr.f32.vlgmr.msra.gmra.mrb[0].mxu1 %v3699_v10  ;;  %v2610_v10 = vpack.c.bf16 %v1268_v28, %v1267_v18  ;;  %v1707_v18 = vld [vmem:[%s4337_s3 + $0x18] sm:$0xff]  ;;  %v1704_v28 = vld [vmem:[%s4337_s3] sm:$0xff] }
 0x331   :  { %2354 = vmatprep.mubr.f32.mxu1 %v3705_v8  ;;  %2601 = vmatpush3.bf16.msra.mxu1 %v2598_v24  ;;  %v1269_v8 = vld [vmem:[%s4336_s2 + $0x1c0] sm:$0xff] }
 0x332   :  { %2603 = vmatprep.subr.bf16.mxu1 %v2602_v26 }
 0x334   :  { %2355 = vmatmul.mubr.f32.gmra.mrb[2].mxu1 %v3720_v23  ;;  %v2614_v23 = vpack.c.bf16 %v1270_v32, %v1269_v8 }
 0x335   :  { %2357 = vmatprep.mubr.f32.mxu1 %v3635_v13  ;;  %2605 = vmatpush3.bf16.msra.mxu1 %v2602_v26 }
 0x336   :  { %2607 = vmatprep.subr.bf16.mxu1 %v2606_v41 }
 0x338   :  { %2358 = vmatmul.mubr.f32.gmra.mrb[4].mxu1 %v3638_v35 }
 0x339   :  { %2360 = vmatprep.mubr.f32.mxu1 %v3641_v60  ;;  %2609 = vmatpush3.bf16.msra.mxu1 %v2606_v41  ;;  %v1705_v41 = vld [vmem:[%s4337_s3 + $0x8] sm:$0xff] }
 0x33a   :  { %2611 = vmatprep.subr.bf16.mxu1 %v2610_v10  ;;  %v2662_v32 = vpack.c.bf16 %v1707_v18, %v1705_v41  ;;  %v1738_v41 = vld [vmem:[%s4337_s3 + $0x110] sm:$0xff]  ;;  %v1741_v18 = vld [vmem:[%s4337_s3 + $0x128] sm:$0xff] }
 0x33c   :  { %2361 = vmatmul.mubr.f32.gmra.mrb[6].mxu1 %v3644_v9  ;;  %2663 = vmatprep.subr.bf16.mxu0 %v2662_v32 }
 0x33d   :  { %2613 = vmatpush3.bf16.msra.mxu1 %v2610_v10  ;;  %2395 = vmatprep.mubr.f32.mxu1 %v3635_v13  ;;  %v1276_v13 = vld [vmem:[%s4336_s2 + $0x1f8] sm:$0xff] }
 0x33e   :  { %2615 = vmatprep.subr.bf16.mxu1 %v2614_v23  ;;  %v2626_v6 = vpack.c.bf16 %v1276_v13, %v1275_v51  ;;  %v1709_v13 = vld [vmem:[%s4337_s3 + $0x28] sm:$0xff] }
 0x341   :  { %2617 = vmatpush3.bf16.msra.mxu1 %v2614_v23  ;;  %v1706_v23 = vld [vmem:[%s4337_s3 + $0x10] sm:$0xff] }
 0x342   :  { %2619 = vmatprep.subr.bf16.mxu1 %v2618_v43 }
 0x345   :  { %2621 = vmatpush3.bf16.msra.mxu1 %v2618_v43  ;;  %v2664_v43 = vpack.c.bf16 %v1706_v23, %v1704_v28  ;;  %v1743_v28 = vld [vmem:[%s4337_s3 + $0x138] sm:$0xff]  ;;  %v1740_v23 = vld [vmem:[%s4337_s3 + $0x120] sm:$0xff] }
 0x346   :  { %2623 = vmatprep.subr.bf16.mxu1 %v2622_v63  ;;  %v2698_v32 = vpack.c.bf16 %v1743_v28, %v1741_v18  ;;  %v1868_v18 = vld [vmem:[%s4338_s4 + $0x80] sm:$0xff]  ;;  %v1869_v28 = vld [vmem:[%s4338_s4 + $0x88] sm:$0xff] }
 0x347   :  { %2665 = vmatpush1.bf16.msra.mxu0 %v2664_v43 }
 0x349   :  { %2625 = vmatpush3.bf16.msra.mxu1 %v2622_v63 }
 0x34a   :  { %2627 = vmatprep.subr.bf16.mxu1 %v2626_v6 }
 0x34d   :  { %2629 = vmatpush3.bf16.msra.mxu1 %v2626_v6  ;;  %v1711_v6 = vld [vmem:[%s4337_s3 + $0x38] sm:$0xff] }
 0x34e   :  { %2631 = vmatprep.subr.bf16.mxu1 %v2630_v57  ;;  %v2666_v20 = vpack.c.bf16 %v1711_v6, %v1709_v13  ;;  %v1744_v13 = vld [vmem:[%s4337_s3 + $0x140] sm:$0xff] }
 0x350   :  { %2396 = vmatmul.mubr.f32.vlgmr.msra.gmra.mrb[0].mxu1 %v3638_v35  ;;  %v2642_v35 = vpack.c.bf16 %v1397_v62, %v1396_v46  ;;  %2667 = vmatprep.subr.bf16.mxu0 %v2666_v20  ;;  %v1717_v46 = vld [vmem:[%s4337_s3 + $0x68] sm:$0xff]  ;;  %v1719_v62 = vld [vmem:[%s4337_s3 + $0x78] sm:$0xff] }
 0x351   :  { %2398 = vmatprep.mubr.f32.mxu1 %v3641_v60  ;;  %2633 = vmatpush3.bf16.msra.mxu1 %v2630_v57  ;;  %v1398_v60 = vld [vmem:[%s4336_s2 + $0x240] sm:$0xff]  ;;  %v1710_v57 = vld [vmem:[%s4337_s3 + $0x30] sm:$0xff] }
 0x352   :  { %2635 = vmatprep.subr.bf16.mxu1 %v2634_v61  ;;  %v2668_v49 = vpack.c.bf16 %v1710_v57, %v1708_v21  ;;  %v1746_v21 = vld [vmem:[%s4337_s3 + $0x150] sm:$0xff] }
 0x353   :  { %v2704_v20 = vpack.c.bf16 %v1746_v21, %v1744_v13  ;;  %v1854_v13 = vld [vmem:[%s4338_s4 + $0x10] sm:$0xff]  ;;  %v1872_v21 = vld [vmem:[%s4338_s4 + $0xa0] sm:$0xff] }
 0x354   :  { %2399 = vmatmul.mubr.f32.gmra.mrb[2].mxu1 %v3644_v9  ;;  %v2646_v9 = vpack.c.bf16 %v1399_v40, %v1398_v60  ;;  %2669 = vmatpush1.bf16.msra.mxu0 %v2668_v49  ;;  %v2674_v60 = vpack.c.bf16 %v1719_v62, %v1717_v46  ;;  %v1716_v40 = vld [vmem:[%s4337_s3 + $0x60] sm:$0xff] }
 0x355   :  { %2401 = vmatprep.mubr.f32.mxu1 %v3670_v5  ;;  %2637 = vmatpush3.bf16.msra.mxu1 %v2634_v61  ;;  %v1715_v61 = vld [vmem:[%s4337_s3 + $0x58] sm:$0xff] }
 0x356   :  { %2639 = vmatprep.subr.bf16.mxu1 %v2638_v31  ;;  %v2670_v33 = vpack.c.bf16 %v1715_v61, %v1713_v56 }
 0x358   :  { %2402 = vmatmul.mubr.f32.gmra.mrb[4].mxu1 %v3673_v4  ;;  %2671 = vmatprep.subr.bf16.mxu0 %v2670_v33 }
 0x359   :  { %2404 = vmatprep.mubr.f32.mxu1 %v3676_v15  ;;  %2641 = vmatpush3.bf16.msra.mxu1 %v2638_v31  ;;  %v1714_v31 = vld [vmem:[%s4337_s3 + $0x50] sm:$0xff] }
 0x35a   :  { %2643 = vmatprep.subr.bf16.mxu1 %v2642_v35 }
 0x35c   :  { %2405 = vmatmul.mubr.f32.gmra.mrb[6].mxu1 %v3682_v16 }
 0x35d   :  { %2645 = vmatpush3.bf16.msra.mxu1 %v2642_v35  ;;  %2439 = vmatprep.mubr.f32.mxu1 %v3670_v5  ;;  %v1405_v5 = vld [vmem:[%s4336_s2 + $0x278] sm:$0xff]  ;;  %v2672_v35 = vpack.c.bf16 %v1714_v31, %v1712_v12  ;;  %s2869_s2 = smov [#allocation2]  }
 0x35e   :  { %2647 = vmatprep.subr.bf16.mxu1 %v2646_v9  ;;  %v2658_v22 = vpack.c.bf16 %v1405_v5, %v1404_v48  ;;  %v1725_v48 = vld [vmem:[%s4337_s3 + $0xa8] sm:$0xff]  ;;  %v1727_v5 = vld [vmem:[%s4337_s3 + $0xb8] sm:$0xff] }
 0x35f   :  { %2673 = vmatpush1.bf16.msra.mxu0 %v2672_v35 }
 0x360   :  { %2675 = vmatprep.subr.bf16.mxu0 %v2674_v60  ;;  %v1748_v60 = vld [vmem:[%s4337_s3 + $0x160] sm:$0xff] }
 0x361   :  { %2649 = vmatpush3.bf16.msra.mxu1 %v2646_v9  ;;  %v1718_v9 = vld [vmem:[%s4337_s3 + $0x70] sm:$0xff] }
 0x362   :  { %2651 = vmatprep.subr.bf16.mxu1 %v2650_v14 }
 0x365   :  { %2653 = vmatpush3.bf16.msra.mxu1 %v2650_v14  ;;  %v2676_v14 = vpack.c.bf16 %v1718_v9, %v1716_v40 }
 0x366   :  { %2655 = vmatprep.subr.bf16.mxu1 %v2654_v54 }
 0x367   :  { %2677 = vmatpush1.bf16.msra.mxu0 %v2676_v14 }
 0x368   :  { %2679 = vmatprep.subr.bf16.mxu0 %v2678_v55 }
 0x369   :  { %2657 = vmatpush3.bf16.msra.mxu1 %v2654_v54  ;;  %v1722_v54 = vld [vmem:[%s4337_s3 + $0x90] sm:$0xff] }
 0x36a   :  { %2659 = vmatprep.subr.bf16.mxu1 %v2658_v22 }
 0x36d   :  { %2661 = vmatpush3.bf16.msra.mxu1 %v2658_v22  ;;  %v2680_v22 = vpack.c.bf16 %v1722_v54, %v1720_v47 }
 0x36f   :  { %2681 = vmatpush1.bf16.msra.mxu0 %v2680_v22  ;;  %v1753_v22 = vld [vmem:[%s4337_s3 + $0x188] sm:$0xff] }
 0x370   :  { %2440 = vmatmul.mubr.f32.vlgmr.msra.gmra.mrb[0].mxu1 %v3673_v4 }
 0x371   :  { %2442 = vmatprep.mubr.f32.mxu1 %v3676_v15 }
 0x374   :  { %2443 = vmatmul.mubr.f32.gmra.mrb[2].mxu1 %v3682_v16 }
 0x375   :  { %2445 = vmatprep.mubr.f32.mxu1 %v3685_v1 }
 0x378   :  { %2446 = vmatmul.mubr.f32.gmra.mrb[4].mxu1 %v3688_v0 }
 0x379   :  { %2448 = vmatprep.mubr.f32.mxu1 %v3696_v37 }
 0x37c   :  { %2449 = vmatmul.mubr.f32.gmra.mrb[6].mxu1 %v3702_v30 }
 0x443   :  { %v2441_v53 = vpop.f32.mrb[0].mxu1 }
 0x444   :  { %v1472_v58 = vpop.f32.mrb[1].mxu1  ;;  %v1520_v29 = vadd.f32 %v2441_v53, %v36_v17  ;;  %v2682_v53 = vpack.c.bf16 %v1727_v5, %v1725_v48 }
 0x445   :  { %v1519_v15 = vadd.f32 %v1472_v58, %v36_v17  ;;  %v1724_v58 = vld [vmem:[%s4337_s3 + $0xa0] sm:$0xff] }
 0x446   :  { %v1528_v52 = vmax.f32 %v1520_v29, 0.0  ;;  %2683 = vmatprep.subr.bf16.mxu0 %v2682_v53  ;;  %v1755_v53 = vld [vmem:[%s4337_s3 + $0x198] sm:$0xff] }
 0x447   :  { %v2444_v34 = vpop.f32.mrb[2].mxu1  ;;  %v1527_v37 = vmax.f32 %v1519_v15, 0.0 }
 0x448   :  { %v1482_v4 = vpop.f32.mrb[3].mxu1  ;;  %v1522_v0 = vadd.f32 %v2444_v34, %v36_v17  ;;  %v1729_v34 = vld [vmem:[%s4337_s3 + $0xc8] sm:$0xff] }
 0x449   :  { %v1521_v45 = vadd.f32 %v1482_v4, %v36_v17  ;;  %v1731_v4 = vld [vmem:[%s4337_s3 + $0xd8] sm:$0xff] }
 0x44a   :  { %v1530_v25 = vmax.f32 %v1522_v0, 0.0  ;;  %v2686_v15 = vpack.c.bf16 %v1731_v4, %v1729_v34  ;;  %v1754_v34 = vld [vmem:[%s4337_s3 + $0x190] sm:$0xff]  ;;  %v1757_v4 = vld [vmem:[%s4337_s3 + $0x1a8] sm:$0xff] }
 0x44b   :  { %v2447_v50 = vpop.f32.mrb[4].mxu1  ;;  %v1529_v39 = vmax.f32 %v1521_v45, 0.0  ;;  %v1737_v45 = vld [vmem:[%s4337_s3 + $0x108] sm:$0xff] }
 0x44c   :  { %v1524_v16 = vadd.f32 %v2447_v50, %v36_v17  ;;  %v1492_v2 = vpop.f32.mrb[5].mxu1  ;;  %v1728_v50 = vld [vmem:[%s4337_s3 + $0xc0] sm:$0xff] }
 0x44d   :  { %v1523_v1 = vadd.f32 %v1492_v2, %v36_v17  ;;  %v1733_v2 = vld [vmem:[%s4337_s3 + $0xe8] sm:$0xff] }
 0x44e   :  { %v1532_v24 = vmax.f32 %v1524_v16, 0.0  ;;  %v1730_v16 = vld [vmem:[%s4337_s3 + $0xd0] sm:$0xff] }
 0x44f   :  { %v1531_v30 = vmax.f32 %v1523_v1, 0.0  ;;  %v2450_v19 = vpop.f32.mrb[6].mxu1  ;;  %v1735_v1 = vld [vmem:[%s4337_s3 + $0xf8] sm:$0xff] }
 0x450   :  { %v3926_v26 = vmax.f32 %v1528_v52, %v1532_v24  ;;  %v1526_v27 = vadd.f32 %v2450_v19, %v36_v17  ;;  %v1502_v11 = vpop.f32.mrb[7].mxu1  ;;  %v2688_v52 = vpack.c.bf16 %v1730_v16, %v1728_v50  ;;  %v2690_v0 = vpack.c.bf16 %v1735_v1, %v1733_v2  ;;  %v1732_v24 = vld [vmem:[%s4337_s3 + $0xe0] sm:$0xff]  ;;  %v1758_v16 = vld [vmem:[%s4337_s3 + $0x1b0] sm:$0xff]  ;;  %v1761_v1 = vld [vmem:[%s4337_s3 + $0x1c8] sm:$0xff] }
 0x451   :  { %v3937_v10 = vmax.f32 %v1527_v37, %v1531_v30  ;;  %v1525_v8 = vadd.f32 %v1502_v11, %v36_v17  ;;  %v1726_v17 = vld [vmem:[%s4337_s3 + $0xb0] sm:$0xff]  ;;  %v1739_v30 = vld [vmem:[%s4337_s3 + $0x118] sm:$0xff]  ;;  %v1736_v11 = vld [vmem:[%s4337_s3 + $0x100] sm:$0xff] }
 0x452   :  { %v1534_v42 = vmax.f32 %v1526_v27, 0.0  ;;  %v2684_v29 = vpack.c.bf16 %v1726_v17, %v1724_v58  ;;  %v1734_v37 = vld [vmem:[%s4337_s3 + $0xf0] sm:$0xff]  ;;  %v2694_v27 = vpack.c.bf16 %v1739_v30, %v1737_v45  ;;  %v2710_v58 = vpack.c.bf16 %v1755_v53, %v1753_v22  ;;  %v1752_v17 = vld [vmem:[%s4337_s3 + $0x180] sm:$0xff]  ;;  %v1765_v30 = vld [vmem:[%s4337_s3 + $0x1e8] sm:$0xff] }
 0x453   :  { %v1533_v44 = vmax.f32 %v1525_v8, 0.0  ;;  %1543 = vrot.lane.b32.xlu1 %v3937_v10, %s2857_s23  ;;  %v2692_v19 = vpack.c.bf16 %v1734_v37, %v1732_v24  ;;  %v2696_v8 = vpack.c.bf16 %v1738_v41, %v1736_v11  ;;  %v1756_v50 = vld [vmem:[%s4337_s3 + $0x1a0] sm:$0xff]  ;;  %v1762_v45 = vld [vmem:[%s4337_s3 + $0x1d0] sm:$0xff]  ;;  %v1881_v53 = vld [vmem:[%s4338_s4 + $0xe8] sm:$0xff] }
 0x454   :  { %v3944_v63 = vmax.f32 %v1530_v25, %v1534_v42  ;;  %2685 = vmatpush1.bf16.msra.mxu0 %v2684_v29  ;;  %v1742_v25 = vld [vmem:[%s4337_s3 + $0x130] sm:$0xff]  ;;  %v2712_v29 = vpack.c.bf16 %v1754_v34, %v1752_v17  ;;  %v1760_v37 = vld [vmem:[%s4337_s3 + $0x1c0] sm:$0xff] }
 0x455   :  { %v3946_v51 = vmax.f32 %v1529_v39, %v1533_v44  ;;  %2687 = vmatprep.subr.bf16.mxu0 %v2686_v15  ;;  %v2700_v42 = vpack.c.bf16 %v1742_v25, %v1740_v23  ;;  %v1745_v39 = vld [vmem:[%s4337_s3 + $0x148] sm:$0xff]  ;;  %v1747_v44 = vld [vmem:[%s4337_s3 + $0x158] sm:$0xff]  ;;  %v1766_v11 = vld [vmem:[%s4337_s3 + $0x1f0] sm:$0xff]  ;;  %v2720_v41 = vpack.c.bf16 %v1762_v45, %v1760_v37  ;;  %v2726_v23 = vpack.c.bf16 %v1869_v28, %v1868_v18 }
 0x456   :  { %v2702_v6 = vpack.c.bf16 %v1747_v44, %v1745_v39  ;;  %v1759_v15 = vld [vmem:[%s4337_s3 + $0x1b8] sm:$0xff]  ;;  %v1853_v25 = vld [vmem:[%s4338_s4 + $0x8] sm:$0xff]  ;;  %v1880_v22 = vld [vmem:[%s4338_s4 + $0xe0] sm:$0xff] }
 0x457   :  { %1545 = vrot.lane.b32.xlu1 %v3926_v26, %s2857_s23  ;;  %1547 = vrot.lane.b32.xlu0 %v3946_v51, %s2857_s23  ;;  %v2714_v2 = vpack.c.bf16 %v1759_v15, %v1757_v4  ;;  %v2750_v17 = vpack.c.bf16 %v1881_v53, %v1880_v22 }
 0x458   :  { %2689 = vmatpush1.bf16.msra.mxu0 %v2688_v52  ;;  %v1763_v52 = vld [vmem:[%s4337_s3 + $0x1d8] sm:$0xff]  ;;  %2727 = vmatprep.subr.bf16.mxu1 %v2726_v23 }
 0x459   :  { %2691 = vmatprep.subr.bf16.mxu0 %v2690_v0  ;;  %v2716_v0 = vpack.c.bf16 %v1758_v16, %v1756_v50  ;;  %v2718_v24 = vpack.c.bf16 %v1763_v52, %v1761_v1 }
 0x45b   :  { %1549 = vrot.lane.b32.xlu0 %v3944_v63, %s2857_s23 }
 0x45c   :  { %2693 = vmatpush1.bf16.msra.mxu0 %v2692_v19  ;;  %v1767_v19 = vld [vmem:[%s4337_s3 + $0x1f8] sm:$0xff] }
 0x45d   :  { %2695 = vmatprep.subr.bf16.mxu0 %v2694_v27  ;;  %v1764_v27 = vld [vmem:[%s4337_s3 + $0x1e0] sm:$0xff] }
 0x460   :  { %2697 = vmatpush1.bf16.msra.mxu0 %v2696_v8  ;;  %v1852_v8 = vld [vmem:[%s4338_s4] sm:$0xff] }
 0x461   :  { %2699 = vmatprep.subr.bf16.mxu0 %v2698_v32  ;;  %v2722_v32 = vpack.c.bf16 %v1767_v19, %v1765_v30  ;;  %v2728_v39 = vpack.c.bf16 %v1853_v25, %v1852_v8 }
 0x463   :  { %2729 = vmatpush3.bf16.msra.mxu1 %v2728_v39 }
 0x464   :  { %2701 = vmatpush1.bf16.msra.mxu0 %v2700_v42  ;;  %v1870_v42 = vld [vmem:[%s4338_s4 + $0x90] sm:$0xff] }
 0x465   :  { %2703 = vmatprep.subr.bf16.mxu0 %v2702_v6  ;;  %v1855_v6 = vld [vmem:[%s4338_s4 + $0x18] sm:$0xff] }
 0x468   :  { %2705 = vmatpush1.bf16.msra.mxu0 %v2704_v20  ;;  %v1873_v20 = vld [vmem:[%s4338_s4 + $0xa8] sm:$0xff] }
 0x4c5   :  { %v1544_v43 = vpop.permute.xlu1 %1543 }
 0x4c6   :  { %v4077_v31 = vmax.f32 %v3937_v10, %v1544_v43  ;;  %v1750_v10 = vld [vmem:[%s4337_s3 + $0x170] sm:$0xff]  ;;  %v1871_v43 = vld [vmem:[%s4338_s4 + $0x98] sm:$0xff] }
 0x4c7   :  { %v2708_v59 = vpack.c.bf16 %v1750_v10, %v1748_v60  ;;  %v2730_v44 = vpack.c.bf16 %v1871_v43, %v1870_v42  ;;  %v1876_v60 = vld [vmem:[%s4338_s4 + $0xc0] sm:$0xff]  ;;  %v1877_v10 = vld [vmem:[%s4338_s4 + $0xc8] sm:$0xff] }
 0x4c8   :  { %v1560_v9 = vrot.slane %v4077_v31, 2  ;;  %v1564_v14 = vrot.slane %v4077_v31, 4 }
 0x4c9   :  { %v1546_v57 = vpop.permute.xlu1 %1545  ;;  %v1548_v49 = vpop.permute.xlu0 %1547  ;;  %2731 = vmatprep.subr.bf16.mxu1 %v2730_v44 }
 0x4ca   :  { %v1556_v56 = vmax.f32 %v3926_v26, %v1546_v57  ;;  %v1749_v26 = vld [vmem:[%s4337_s3 + $0x168] sm:$0xff]  ;;  %v4093_v40 = vmax.f32 %v3946_v51, %v1548_v49  ;;  %v1568_v51 = vrot.slane %v4077_v31, 6  ;;  %v2724_v57 = vpack.c.bf16 %v1766_v11, %v1764_v27 }
 0x4cb   :  { %v2732_v49 = vpack.c.bf16 %v1855_v6, %v1854_v13 }
 0x4cc   :  { %1573 = vrot.lane.b32.xlu1 %v1556_v56, %s2864_s21  ;;  %v1576_v33 = vrot.slane %v1556_v56, 2  ;;  %v1580_v46 = vrot.slane %v1556_v56, 4  ;;  %v1589_v55 = vrot.slane %v4093_v40, 2  ;;  %v1593_v47 = vrot.slane %v4093_v40, 4 }
 0x4cd   :  { %v1550_v61 = vpop.permute.xlu0 %1549  ;;  %v1584_v54 = vrot.slane %v1556_v56, 6  ;;  %v1597_v48 = vrot.slane %v4093_v40, 6  ;;  %v2734_v56 = vpack.c.bf16 %v1873_v20, %v1872_v21  ;;  %2733 = vmatpush3.bf16.msra.mxu1 %v2732_v49 }
 0x4ce   :  { %v1558_v12 = vmax.f32 %v3944_v63, %v1550_v61  ;;  %v1751_v63 = vld [vmem:[%s4337_s3 + $0x178] sm:$0xff]  ;;  %v1856_v61 = vld [vmem:[%s4338_s4 + $0x20] sm:$0xff]  ;;  %s2055_s3 = sshll.u32 %s2869_s2, 4  ;;  %s2056_s3 = int_to_ptr.vmem [resolvable:$true] %s2055_s3 }
 0x4cf   :  { %v2706_v35 = vpack.c.bf16 %v1751_v63, %v1749_v26  ;;  %2735 = vmatprep.subr.bf16.mxu1 %v2734_v56  ;;  %v1858_v63 = vld [vmem:[%s4338_s4 + $0x30] sm:$0xff]  ;;  %p2834_p1 = scmp.lt.s32.totalorder %s2056_s3, %s2056_s3 }
 0x4d0   :  { %1577 = vrot.lane.b32.xlu1 %v1576_v33, %s2865_s1  ;;  %1602 = vrot.lane.b32.xlu0 %v1558_v12, %s2864_s21  ;;  %v1605_v62 = vrot.slane %v1558_v12, 2  ;;  %v1609_v3 = vrot.slane %v1558_v12, 4  ;;  %v1613_v5 = vrot.slane %v1558_v12, 6  ;;  %v1857_v12 = vld [vmem:[%s4338_s4 + $0x28] sm:$0xff]  ;;  %v1874_v33 = vld [vmem:[%s4338_s4 + $0xb0] sm:$0xff] }
 0x4d1   :  { %2707 = vmatprep.subr.bf16.mxu0 %v2706_v35  ;;  %v1859_v35 = vld [vmem:[%s4338_s4 + $0x38] sm:$0xff] }
 0x4d2   :  { %2709 = vmatpush1.bf16.msra.mxu0 %v2708_v59  ;;  %v1860_v59 = vld [vmem:[%s4338_s4 + $0x40] sm:$0xff] }
 0x4d3   :  { %2711 = vmatprep.subr.bf16.mxu0 %v2710_v58 }
 0x4d4   :  { %1581 = vrot.lane.b32.xlu1 %v1580_v46, %s2856_s22  ;;  %1606 = vrot.lane.b32.xlu0 %v1605_v62, %s2865_s1  ;;  %v1875_v46 = vld [vmem:[%s4338_s4 + $0xb8] sm:$0xff]  ;;  %v2736_v62 = vpack.c.bf16 %v1857_v12, %v1856_v61 }
 0x4d5   :  { %v2738_v26 = vpack.c.bf16 %v1875_v46, %v1874_v33 }
 0x4d6   :  { %2713 = vmatpush1.bf16.msra.mxu0 %v2712_v29  ;;  %2737 = vmatpush3.bf16.msra.mxu1 %v2736_v62 }
 0x4d7   :  { %2715 = vmatprep.subr.bf16.mxu0 %v2714_v2  ;;  %2739 = vmatprep.subr.bf16.mxu1 %v2738_v26 }
 0x4d8   :  { %1561 = vrot.lane.b32.xlu1 %v1560_v9, %s2859_s10  ;;  %1610 = vrot.lane.b32.xlu0 %v1609_v3, %s2856_s22  ;;  %v2740_v9 = vpack.c.bf16 %v1859_v35, %v1858_v63  ;;  %v2742_v3 = vpack.c.bf16 %v1877_v10, %v1876_v60 }
 0x4da   :  { %2717 = vmatpush1.bf16.msra.mxu0 %v2716_v0  ;;  %2741 = vmatpush3.bf16.msra.mxu1 %v2740_v9 }
 0x4db   :  { %2719 = vmatprep.subr.bf16.mxu0 %v2718_v24  ;;  %2743 = vmatprep.subr.bf16.mxu1 %v2742_v3 }
 0x4dc   :  { %1565 = vrot.lane.b32.xlu1 %v1564_v14, %s2862_s0  ;;  %1590 = vrot.lane.b32.xlu0 %v1589_v55, %s2859_s10  ;;  %v1861_v14 = vld [vmem:[%s4338_s4 + $0x48] sm:$0xff]  ;;  %v1878_v55 = vld [vmem:[%s4338_s4 + $0xd0] sm:$0xff] }
 0x4de   :  { %2721 = vmatpush1.bf16.msra.mxu0 %v2720_v41 }
 0x4df   :  { %2723 = vmatprep.subr.bf16.mxu0 %v2722_v32 }
 0x4e0   :  { %1569 = vrot.lane.b32.xlu1 %v1568_v51, %s2866_s9  ;;  %1594 = vrot.lane.b32.xlu0 %v1593_v47, %s2862_s0  ;;  %v1879_v51 = vld [vmem:[%s4338_s4 + $0xd8] sm:$0xff]  ;;  %v2744_v47 = vpack.c.bf16 %v1861_v14, %v1860_v59 }
 0x4e2   :  { %2725 = vmatpush1.bf16.msra.mxu0 %v2724_v57  ;;  %2745 = vmatpush3.bf16.msra.mxu1 %v2744_v47 }
 0x4e4   :  { %1585 = vrot.lane.b32.xlu1 %v1584_v54, %s2857_s23  ;;  %1598 = vrot.lane.b32.xlu0 %v1597_v48, %s2866_s9  ;;  %v2746_v54 = vpack.c.bf16 %v1879_v51, %v1878_v55  ;;  %v1862_v48 = vld [vmem:[%s4338_s4 + $0x50] sm:$0xff] }
 0x4e6   :  { %2747 = vmatprep.subr.bf16.mxu1 %v2746_v54 }
 0x4e8   :  { %1614 = vrot.lane.b32.xlu0 %v1613_v5, %s2857_s23  ;;  %v1863_v5 = vld [vmem:[%s4338_s4 + $0x58] sm:$0xff] }
 0x4e9   :  { %v2748_v58 = vpack.c.bf16 %v1863_v5, %v1862_v48 }
 0x4eb   :  { %2749 = vmatpush3.bf16.msra.mxu1 %v2748_v58 }
 0x4ec   :  { %2751 = vmatprep.subr.bf16.mxu1 %v2750_v17 }
 0x53e   :  { %v1574_v34 = vpop.permute.xlu1 %1573 }
 0x542   :  { %v1578_v4 = vpop.permute.xlu1 %1577  ;;  %v1603_v29 = vpop.permute.xlu0 %1602 }
 0x546   :  { %v1582_v15 = vpop.permute.xlu1 %1581  ;;  %v1607_v50 = vpop.permute.xlu0 %1606 }
 0x54a   :  { %v1562_v16 = vpop.permute.xlu1 %1561  ;;  %v1611_v2 = vpop.permute.xlu0 %1610 }
 0x54b   :  { %v1617_v0 = vsel %vm802_vm1, %v4077_v31, %v1562_v16  ;;  %v2063_v16 = vld [vmem:[%s4340_s6 + $0x1] ss:$8 sm:$0x3] }
 0x54e   :  { %v1566_v1 = vpop.permute.xlu1 %1565  ;;  %v1591_v52 = vpop.permute.xlu0 %1590 }
 0x54f   :  { %v1618_v24 = vsel %vm806_vm3, %v1617_v0, %v1566_v1  ;;  %v1628_v27 = vsel %vm802_vm1, %v4093_v40, %v1591_v52  ;;  %v1682_v1 = vrot.slane %v2063_v16, %v3198_v36  ;;  %v2064_v0 = vld [vmem:[%s4340_s6 + $0x2] ss:$8 sm:$0x3] }
 0x552   :  { %v1570_v37 = vpop.permute.xlu1 %1569  ;;  %v1595_v45 = vpop.permute.xlu0 %1594 }
 0x553   :  { %v1619_v30 = vsel %vm810_vm5, %v1618_v24, %v1570_v37  ;;  %v1629_v31 = vsel %vm806_vm3, %v1628_v27, %v1595_v45  ;;  %v1686_v24 = vrot.slane %v2063_v16, %v3203_v38  ;;  %v1695_v27 = vrot.slane %v2064_v0, %v3198_v36 }
 0x554   :  { %v1621_v19 = vsel %vm1620_vm6, %v1619_v30, %v1574_v34  ;;  %v1699_v30 = vrot.slane %v2064_v0, %v3203_v38 }
 0x555   :  { %v1623_v11 = vsel %vm1622_vm7, %v1621_v19, %v1578_v4 }
 0x556   :  { %v1625_v41 = vsel %vm1624_vm8, %v1623_v11, %v1582_v15  ;;  %v1586_v18 = vpop.permute.xlu1 %1585  ;;  %v1599_v28 = vpop.permute.xlu0 %1598 }
 0x557   :  { %v1627_v8 = vsel %vm1626_vm9, %v1625_v41, %v1586_v18  ;;  %v1630_v32 = vsel %vm810_vm5, %v1629_v31, %v1599_v28  ;;  %v1864_v18 = vld [vmem:[%s4338_s4 + $0x60] sm:$0xff]  ;;  %v1865_v28 = vld [vmem:[%s4338_s4 + $0x68] sm:$0xff] }
 0x558   :  { %v1636_v23 = vsel %vm1635_vm10, %v1627_v8, 0.0  ;;  %v1631_v25 = vsel %vm1620_vm6, %v1630_v32, %v1603_v29  ;;  %v1882_v32 = vld [vmem:[%s4338_s4 + $0xf0] sm:$0xff] }
 0x559   :  { %v1637_v42 = vrot.slane %v1636_v23, 4  ;;  %v1632_v40 = vsel %vm1622_vm7, %v1631_v25, %v1607_v50  ;;  %v1866_v25 = vld [vmem:[%s4338_s4 + $0x70] sm:$0xff] }
 0x55a   :  { %v1633_v43 = vsel %vm1624_vm8, %v1632_v40, %v1611_v2  ;;  %v1615_v39 = vpop.permute.xlu0 %1614  ;;  %v1867_v40 = vld [vmem:[%s4338_s4 + $0x78] sm:$0xff] }
 0x55b   :  { %v1638_v44 = vadd.f32 %v1637_v42, %v1636_v23  ;;  %v1634_v13 = vsel %vm1626_vm9, %v1633_v43, %v1615_v39  ;;  %v1883_v23 = vld [vmem:[%s4338_s4 + $0xf8] sm:$0xff]  ;;  %v2756_v43 = vpack.c.bf16 %v1867_v40, %v1866_v25  ;;  %v2867_v39 = vmov 0.0|0.0  }
 0x55c   :  { %v1643_v6 = vsel %vm1635_vm10, %v1634_v13, 0.0  ;;  %v2754_v42 = vpack.c.bf16 %v1883_v23, %v1882_v32 }
 0x55d   :  { %v1639_v21 = vrot.slane %v1638_v44, 2  ;;  %v1644_v20 = vrot.slane %v1643_v6, 4 }
 0x55f   :  { %v1640_v57 = vadd.f32 %v1639_v21, %v1638_v44  ;;  %v1645_v49 = vadd.f32 %v1644_v20, %v1643_v6  ;;  %v2065_v44 = vld [vmem:[%s4340_s6 + $0x3] ss:$8 sm:$0x3] }
 0x560   :  { %v1776_v6 = vrot.slane %v2065_v44, %v3203_v38  ;;  %v1958_v38 = vld [vmem:[%s4339_s5 + $0x18] sm:$0xff] }
 0x561   :  { %v1641_v56 = vrot.slane %v1640_v57, 1  ;;  %v1646_v61 = vrot.slane %v1645_v49, 2 }
 0x563   :  { %v1642_v12 = vadd.f32 %v1641_v56, %v1640_v57  ;;  %v1647_v33 = vadd.f32 %v1646_v61, %v1645_v49  ;;  %v1955_v49 = vld [vmem:[%s4339_s5] sm:$0xff]  ;;  %v1956_v56 = vld [vmem:[%s4339_s5 + $0x8] sm:$0xff] }
 0x565   :  { %v1650_v46 = vmul.f32 0.5, %v1642_v12  ;;  %v1648_v62 = vrot.slane %v1647_v33, 1 }
 0x567   :  { %v1652_v26 = vsub.f32 %v1627_v8, %v1650_v46  ;;  %v1649_v63 = vadd.f32 %v1648_v62, %v1647_v33  ;;  %v2752_v8 = vpack.c.bf16 %v1865_v28, %v1864_v18  ;;  %v2759_v33 = vpack.c.bf16 %v1956_v56, %v1955_v49 }
 0x569   :  { %v1654_v35 = vmul.f32 %v1652_v26, %v1652_v26  ;;  %v1651_v60 = vmul.f32 0.5, %v1649_v63  ;;  %2753 = vmatpush3.bf16.msra.mxu1 %v2752_v8  ;;  %v1960_v63 = vld [vmem:[%s4339_s5 + $0x28] sm:$0xff] }
 0x56a   :  { %2755 = vmatprep.subr.bf16.mxu1 %v2754_v42 }
 0x56b   :  { %v1656_v10 = vsel %vm1635_vm10, %v1654_v35, 0.0  ;;  %v1653_v9 = vsub.f32 %v1634_v13, %v1651_v60  ;;  %v1772_v13 = vrot.slane %v2065_v44, %v3198_v36  ;;  %v1957_v36 = vld [vmem:[%s4339_s5 + $0x10] sm:$0xff] }
 0x56c   :  { %v1657_v3 = vrot.slane %v1656_v10, 4  ;;  %v2762_v62 = vpack.c.bf16 %v1958_v38, %v1957_v36  ;;  %v1961_v35 = vld [vmem:[%s4339_s5 + $0x30] sm:$0xff] }
 0x56d   :  { %v1655_v59 = vmul.f32 %v1653_v9, %v1653_v9  ;;  %2757 = vmatpush3.bf16.msra.mxu1 %v2756_v43 }
 0x56e   :  { %v1658_v14 = vadd.f32 %v1657_v3, %v1656_v10  ;;  %2758 = vmatprep.subr.bf16.mxu1 %v2867_v39  ;;  %v1962_v10 = vld [vmem:[%s4339_s5 + $0x38] sm:$0xff] }
 0x56f   :  { %v1663_v55 = vsel %vm1635_vm10, %v1655_v59, 0.0  ;;  %v37_v59 = vld [vmem:[%s4340_s6 + $0x7] ss:$0 sm:$0xff] }
 0x570   :  { %v1659_v51 = vrot.slane %v1658_v14, 2  ;;  %v1664_v47 = vrot.slane %v1663_v55, 4 }
 0x572   :  { %v1660_v54 = vadd.f32 %v1659_v51, %v1658_v14  ;;  %v1665_v48 = vadd.f32 %v1664_v47, %v1663_v55 }
 0x574   :  { %v1661_v5 = vrot.slane %v1660_v54, 1  ;;  %v1666_v22 = vrot.slane %v1665_v48, 2 }
 0x576   :  { %v1662_v53 = vadd.f32 %v1661_v5, %v1660_v54  ;;  %v1667_v58 = vadd.f32 %v1666_v22, %v1665_v48  ;;  %v38_v54 = vld [vmem:[%s4340_s6 + $0x10] ss:$0 sm:$0xff]  ;;  %s2829_s6 = scalar_lea.vmem %s2056_s3, 32 }
 0x577   :  { %p2830_p0 = scmp.ne.s32.totalorder %s2056_s3, %s2829_s6  ;;  %p2835_p2 = scmp.lt.s32.totalorder %s2829_s6, %s2829_s6 }
 0x578   :  { %v1670_v17 = vmul.f32 0.5, %v1662_v53  ;;  %v1668_v34 = vrot.slane %v1667_v58, 1 }
 0x579   :  { %p2836_p3 = por %p2835_p2, %p2834_p1 }
 0x57a   :  { %v1672_v4 = vadd.f32 1e-05, %v1670_v17  ;;  %v1669_v29 = vadd.f32 %v1668_v34, %v1667_v58 }
 0x57b   :  { %p2837_p4 = pnand %p2836_p3, %p2830_p0 }
 0x57c   :  { %2821 = vrsqrt.f32 %v1672_v4  ;;  %v1671_v15 = vmul.f32 0.5, %v1669_v29 }
 0x57e   :  { %v1673_v50 = vadd.f32 1e-05, %v1671_v15 }
 0x580   :  { %2823 = vrsqrt.f32 %v1673_v50 }
 0x586   :  { %v2822_v2 = vpop.eup %2821 }
 0x587   :  { %v1676_v52 = vmul.f32 %v2822_v2, %v1652_v26  ;;  %v1959_v26 = vld [vmem:[%s4339_s5 + $0x20] sm:$0xff] }
 0x588   :  { %v2765_v60 = vpack.c.bf16 %v1960_v63, %v1959_v26 }
 0x589   :  { %v1689_v19 = vmul.f32 %v1682_v1, %v1676_v52 }
 0x58a   :  { %v2824_v37 = vpop.eup %2823 }
 0x58b   :  { %v1677_v45 = vmul.f32 %v2824_v37, %v1653_v9  ;;  %v1702_v41 = vadd.f32 %v1695_v27, %v1689_v19  ;;  %v2768_v9 = vpack.c.bf16 %v1962_v10, %v1961_v35 }
 0x58d   :  { %v1690_v11 = vmul.f32 %v1686_v24, %v1677_v45 }
 0x58f   :  { %v1703_v31 = vadd.f32 %v1699_v30, %v1690_v11 }
 0x591   :  { %1843 = vmatprep.mubr.f32.mxu0 %v1703_v31 }
 0x592   :  { %1844 = vmatmul.mubr.f32.vlgmr.msra.gmra.mrb[96].mxu0 %v1702_v41 }
 0x665   :  { %v1845_v21 = vpop.f32.mrb[96].mxu0 }
 0x666   :  { %v1846_v20 = vadd.f32 %v1845_v21, %v1772_v13  ;;  %v1847_v57 = vpop.f32.mrb[97].mxu0 }
 0x667   :  { %v1848_v61 = vadd.f32 %v1847_v57, %v1776_v6 }
 0x668   :  { %v1850_v46 = vmax.f32 %v1846_v20, 0.0 }
 0x669   :  { %v1851_v12 = vmax.f32 %v1848_v61, 0.0 }
 0x66b   :  { %1948 = vmatprep.mubr.f32.mxu1 %v1851_v12 }
 0x66c   :  { %1949 = vmatmul.mubr.f32.vlgmr.msra.gmra.mrb[8].mxu1 %v1850_v46 }
 0x66d   :  { %2760 = vmatpush3.bf16.msra.mxu1 %v2759_v33  ;;  %2467 = vmatprep.mubr.msk.f32.mxu1 %vm2868_vm11, %v2853_v7 }
 0x66e   :  { %2761 = vmatprep.subr.bf16.mxu1 %v2867_v39 }
 0x671   :  { %2763 = vmatpush3.bf16.msra.mxu1 %v2762_v62 }
 0x672   :  { %2764 = vmatprep.subr.bf16.mxu1 %v2867_v39 }
 0x675   :  { %2766 = vmatpush3.bf16.msra.mxu1 %v2765_v60 }
 0x676   :  { %2767 = vmatprep.subr.bf16.mxu1 %v2867_v39 }
 0x679   :  { %2769 = vmatpush3.bf16.msra.mxu1 %v2768_v9 }
 0x73f   :  { %v2219_v3 = vpop.f32.mrb[8].mxu1 }
 0x740   :  { %v2220_v14 = vpop.f32.mrb[9].mxu1 }
 0x741   :  { %v2221_v55 = vadd.f32 %v2220_v14, %v2219_v3 }
 0x743   :  { %v1951_v51 = vadd.f32 %v2221_v55, %v37_v59 }
 0x745   :  { %v1954_v47 = vmax.f32 %v1951_v51, 0.0 }
 0x747   :  { %2468 = vmatmul.mubr.msk.f32.vlgmr.msra.gmra.mrb[10].mxu1 %vm1620_vm6, %v1954_v47 }
 0x81a   :  { %v2032_v7 = vpop.f32.mrb[10].mxu1 }
 0x81b   :  { %v2033_v48 = vadd.f32 %v2032_v7, %v38_v54  ;;  %v2469_v5 = vpop.f32.mrb[11].mxu1 }
 0x81d   :  { %v2037_v22 = vsel %vm2036_vm12, %v2033_v48, -inf }
 0x81e   :  { %2038 = vmax.xlane.f32.xlu0 %v2037_v22 }
 0x8ab   :  { %v2039_v53 = vpop.xlane.xlu0 %2038 }
 0x8ac   :  { %v2040_v58 = vsub.f32 %v2033_v48, %v2039_v53 }
 0x8ae   :  { %v2041_v17 = vmul.f32 1.442695, %v2040_v58 }
 0x8b0   :  { %2825 = vpow2.f32 %v2041_v17 }
 0x8ba   :  { %v2826_v34 = vpop.eup %2825 }
 0x8bb   :  { %v2043_v4 = vsel %vm2036_vm12, %v2826_v34, 0.0 }
 0x8bc   :  { %2044 = vadd.xlane.f32.xlu1 %v2043_v4 }
 0x949   :  { %v2045_v29 = vpop.xlane.xlu1 %2044 }
 0x94a   :  { %2827 = vrcp.f32 %v2045_v29 }
 0x954   :  { %v2828_v15 = vpop.eup %2827 }
 0x955   :  { %v2047_v50 = vmul.f32 %v2828_v15, %v2826_v34 }
 0x957   :  { %2048 = vst.msk [vmem:[#allocation2] sm:$0x3] %vm2036_vm12, %v2047_v50 }
 0x958   :  { %2840 = shalt.err (!%p2837_p4)
}
 0x959   :  { %s2841_s1 = scalar_lea.hbm %s4341_s7, 32 }
 0x95a   :  { %p2842_p5 = scmp.ne.s32.totalorder %s4341_s7, %s2841_s1  ;;  %p2845_p6 = scmp.lt.u32.totalorder %s2841_s1, %s4341_s7 }
 0x95c   :  { %p2847_p7 = pnand %p2845_p6, %p2842_p5 }
 0x95e   :  { %2850 = shalt.err (!%p2847_p7)
}
 0x95f   :  { %2058 = dma.vmem_to_hbm [thread:$0]  %s2056_s3, 32, %s4341_s7, [#allocation3]  }
 0x960   :  { %2851 = dma.done.wait [#allocation3], 32  }
 0x961   :  { %2852 = vsyncadd [#allocation3], 4294967264 }
 0x962   :  { %2062 = vsyncpa [#allocation3], 1 }

</bundles_post_ra>
